<compile_context>
chip_gen: v7x
topology: tpu7x:2x2x1
jax: 0.10.0
libtpu: 0.0.40
codegen_flags: <defaults>
</compile_context>

<pallas_src>
import jax
import jax.numpy as jnp
from jax.experimental import pallas as pl
from jax.experimental.pallas import tpu as pltpu

KERNEL_SIZE = 574   # fixed by the module definition (kernel_size=574)
_BM_CAP = 512       # 2 x (512 x 2296 x 4 B) x-tile buffers ~ 9.4 MiB < v5e 16 MiB


def _round_up(v, m):
    return ((v + m - 1) // m) * m


def _convpool_kernel(x_ref, w_ref, b_ref, o_ref):
    """One GEMM + bias; the whole working set is resident in VMEM.

    x_ref: (bm, KC)  f32 batch tile of the flattened input
    w_ref: (KC, O)   bf16 (or f32) rearranged conv weight, resident
    b_ref: (1, O)    f32 bias, resident
    o_ref: (bm, O)   f32 output tile
    """
    # Cast x on the VPU immediately before the MXU dot (v5e's MXU takes bf16
    # even though its VPU/EUP has no bf16 arithmetic path).
    x = x_ref[...].astype(w_ref.dtype)
    acc = jnp.dot(x, w_ref[...], preferred_element_type=jnp.float32)
    o_ref[...] = (acc + b_ref[...]).astype(o_ref.dtype)


def prepare_convpool_params(weight, bias, *, compute_dtype=jnp.bfloat16):
    """One-time rearrangement of Conv1d params into the kernel layout.

    weight: (O, C, K) -> w_flat (K*C, O); contraction order matches x
            flattened row-major over (L, C).  No lane padding: O stays as-is.
    bias:   (O,)      -> (1, O) in f32.
    compute_dtype=jnp.bfloat16 halves the streamed weight bytes (f32 MXU
    accumulation bounds the error); pass None for exact f32 numerics.
    """
    O, C, K = weight.shape
    w_flat = jnp.transpose(weight, (2, 1, 0)).reshape(K * C, O)
    if compute_dtype is not None:
        w_flat = w_flat.astype(compute_dtype)
    bias2d = bias.reshape(1, O).astype(jnp.float32)
    return w_flat, bias2d


def convpool1d_pallas(x, w_flat, bias2d, *, bm=_BM_CAP):
    """x: (B, L, C) with L == KERNEL_SIZE; w_flat/bias2d from prepare_*()."""
    B, L, C = x.shape
    KC, O = w_flat.shape
    assert L == KERNEL_SIZE and L * C == KC, "shape mismatch with Conv1d(k=574)"

    # Row-major flatten over (L, C): contiguous, matches the weight layout.
    x_flat = x.reshape(B, KC)

    # Batch tiling: v5e scoped-VMEM cap, and >=2 grid steps for v7x's 2 TCs
    # when the batch is large.  At the production B=2 this is one full block.
    bm = max(1, min(bm, _BM_CAP))
    if B <= bm:
        bm = B
    else:
        bm = min(bm, _round_up(pl.cdiv(B, 2), 8))
    n_b = pl.cdiv(B, bm)

    itemsize = x_flat.dtype.itemsize
    cost = pl.CostEstimate(
        flops=2 * B * KC * O,
        transcendentals=0,
        bytes_accessed=(B * KC * itemsize
                        + KC * O * w_flat.dtype.itemsize
                        + O * bias2d.dtype.itemsize
                        + B * O * itemsize),
    )

    def call(single_buffer_constants):
        # Constant-index weight / bias: single-buffer them (never refetched).
        const_kw = (
            dict(pipeline_mode=pl.Buffered(1)) if single_buffer_constants else {}
        )
        return pl.pallas_call(
            _convpool_kernel,
            out_shape=jax.ShapeDtypeStruct((B, O), x.dtype),
            grid_spec=pltpu.PrefetchScalarGridSpec(
                num_scalar_prefetch=0,
                grid=(n_b,),
                in_specs=[
                    pl.BlockSpec((bm, KC), lambda b: (b, 0)),             # x tile
                    pl.BlockSpec((KC, O), lambda b: (0, 0), **const_kw),  # weight
                    pl.BlockSpec((1, O), lambda b: (0, 0), **const_kw),   # bias
                ],
                out_specs=pl.BlockSpec((bm, O), lambda b: (b, 0)),
            ),
            compiler_params=pltpu.CompilerParams(
                # Batch axis is independent -> megacore / v7x 2-TC sharding.
                dimension_semantics=("parallel",),
            ),
            cost_estimate=cost,
        )(x_flat, w_flat, bias2d)

    try:
        return call(True)
    except Exception:
        # BlockSpec pipeline_mode / pl.Buffered(1) unavailable on this jax
        # version: fall back to default double-buffering (VMEM headroom only,
        # identical results).
        return call(False)


def _reference(x, weight, bias):
    # Pure-JAX f32 reference of the PyTorch forward (conv collapsed to einsum).
    return jnp.einsum("bkc,ock->bo", x, weight) + bias[None, :]


if __name__ == "__main__":
    # Small shapes consistent with the module: L is pinned to 574 by the fixed
    # kernel_size; keep channel dims small.
    B, C, O = 2, 4, 8
    L = KERNEL_SIZE

    key = jax.random.PRNGKey(0)
    kx, kw, kb = jax.random.split(key, 3)

    x = jax.random.normal(kx, (B, L, C), dtype=jnp.float32)
    # Deterministic init mimicking Conv1d's uniform(-bound, bound) fan-in init.
    fan_in = C * KERNEL_SIZE
    bound = 1.0 / (fan_in ** 0.5)
    weight = jax.random.uniform(
        kw, (O, C, KERNEL_SIZE), dtype=jnp.float32, minval=-bound, maxval=bound
    )
    bias = jax.random.uniform(
        kb, (O,), dtype=jnp.float32, minval=-bound, maxval=bound
    )

    # One-time weight rearrangement (constant per model instance); bf16 weight
    # stream by default.  Use compute_dtype=None for exact-f32 numerics.
    w_flat, bias2d = prepare_convpool_params(weight, bias)
    w_flat = jax.block_until_ready(w_flat)

    out = convpool1d_pallas(x, w_flat, bias2d)
    out = jax.block_until_ready(out)

    ref = _reference(x, weight, bias)
    assert out.shape == (B, O), out.shape
    # Tolerance accounts for the bf16 x/w quantization (f32 accumulation keeps
    # the error ~1e-3 of the output scale at this reduction length).
    assert jnp.allclose(out, ref, atol=3e-2, rtol=3e-2), (
        f"max abs err {jnp.max(jnp.abs(out - ref))}"
    )
    print("KERNEL_OK")
</pallas_src>

<mosaic_0001>
module attributes {stable_mosaic.version = 11 : i64} {
  func.func @_convpool_kernel(%arg0: i32, %arg1: memref<2x2296xf32, #tpu.memory_space<vmem>>, %arg2: memref<2296x8xbf16, #tpu.memory_space<vmem>>, %arg3: memref<1x8xf32, #tpu.memory_space<vmem>>, %arg4: memref<2x8xf32, #tpu.memory_space<vmem>>) attributes {dimension_semantics = [#tpu.dimension_semantics<parallel>], iteration_bounds = array<i64: 1>, scalar_prefetch = 0 : i64, scratch_operands = 0 : i64, tpu.core_type = #tpu.core_type<tc>, window_params = [{transform_indices = @transform_0, window_bounds = array<i64: 2, 2296>}, {pipeline_mode = #tpu.pipeline_mode<synchronous>, transform_indices = @transform_1, window_bounds = array<i64: 2296, 8>}, {pipeline_mode = #tpu.pipeline_mode<synchronous>, transform_indices = @transform_2, window_bounds = array<i64: 1, 8>}, {transform_indices = @transform_3, window_bounds = array<i64: 2, 8>}]} {
    %c0 = arith.constant 0 : index
    %c0_0 = arith.constant 0 : index
    %0 = vector.load %arg1[%c0, %c0_0] : memref<2x2296xf32, #tpu.memory_space<vmem>>, vector<2x2296xf32>
    %1 = arith.truncf %0 : vector<2x2296xf32> to vector<2x2296xbf16>
    %c0_1 = arith.constant 0 : index
    %c0_2 = arith.constant 0 : index
    %2 = vector.load %arg2[%c0_1, %c0_2] : memref<2296x8xbf16, #tpu.memory_space<vmem>>, vector<2296x8xbf16>
    %cst = arith.constant dense<0.000000e+00> : vector<2x8xf32>
    %3 = tpu.matmul %1, %2, %cst {dimension_numbers = #tpu.dot_dimension_numbers<[1], [0], [0], [1], [0, 0, 1, 1], [], []>} : vector<2x2296xbf16>, vector<2296x8xbf16>, vector<2x8xf32> -> vector<2x8xf32>
    %c0_3 = arith.constant 0 : index
    %c0_4 = arith.constant 0 : index
    %4 = vector.load %arg3[%c0_3, %c0_4] : memref<1x8xf32, #tpu.memory_space<vmem>>, vector<1x8xf32>
    %5 = vector.broadcast %4 : vector<1x8xf32> to vector<2x8xf32>
    %6 = arith.addf %3, %5 : vector<2x8xf32>
    %c0_5 = arith.constant 0 : index
    %c0_6 = arith.constant 0 : index
    %7 = vector.load %arg4[%c0_5, %c0_6] : memref<2x8xf32, #tpu.memory_space<vmem>>, vector<2x8xf32>
    tpu.vector_store %arg4[%c0_5, %c0_6], %6 {strides = array<i32>} : memref<2x8xf32, #tpu.memory_space<vmem>>, vector<2x8xf32>,
    return
  }
  func.func @transform_0(%arg0: i32) -> (i32, i32) {
    %c0_i32 = arith.constant 0 : i32
    %c0_i32_0 = arith.constant 0 : i32
    return %arg0, %c0_i32 : i32, i32
  }
  func.func @transform_1(%arg0: i32) -> (i32, i32) {
    %c0_i32 = arith.constant 0 : i32
    %c0_i32_0 = arith.constant 0 : i32
    %c0_i32_1 = arith.constant 0 : i32
    return %c0_i32, %c0_i32_0 : i32, i32
  }
  func.func @transform_2(%arg0: i32) -> (i32, i32) {
    %c0_i32 = arith.constant 0 : i32
    %c0_i32_0 = arith.constant 0 : i32
    %c0_i32_1 = arith.constant 0 : i32
    return %c0_i32, %c0_i32_0 : i32, i32
  }
  func.func @transform_3(%arg0: i32) -> (i32, i32) {
    %c0_i32 = arith.constant 0 : i32
    %c0_i32_0 = arith.constant 0 : i32
    return %arg0, %c0_i32 : i32, i32
  }
}

module attributes {stable_mosaic.version = 11 : i64} {
  func.func @_convpool_kernel(%arg0: i32, %arg1: memref<2x2296xf32, #tpu.memory_space<vmem>>, %arg2: memref<2296x8xbf16, #tpu.memory_space<vmem>>, %arg3: memref<1x8xf32, #tpu.memory_space<vmem>>, %arg4: memref<2x8xf32, #tpu.memory_space<vmem>>) attributes {dimension_semantics = [#tpu.dimension_semantics<parallel>], iteration_bounds = array<i64: 1>, scalar_prefetch = 0 : i64, scratch_operands = 0 : i64, tpu.core_type = #tpu.core_type<tc>, window_params = [{transform_indices = @transform_0, window_bounds = array<i64: 2, 2296>}, {pipeline_mode = #tpu.pipeline_mode<synchronous>, transform_indices = @transform_1, window_bounds = array<i64: 2296, 8>}, {pipeline_mode = #tpu.pipeline_mode<synchronous>, transform_indices = @transform_2, window_bounds = array<i64: 1, 8>}, {transform_indices = @transform_3, window_bounds = array<i64: 2, 8>}]} {
    %c0 = arith.constant 0 : index
    %c0_0 = arith.constant 0 : index
    %0 = vector.load %arg1[%c0, %c0_0] : memref<2x2296xf32, #tpu.memory_space<vmem>>, vector<2x2296xf32>
    %1 = arith.truncf %0 : vector<2x2296xf32> to vector<2x2296xbf16>
    %c0_1 = arith.constant 0 : index
    %c0_2 = arith.constant 0 : index
    %2 = vector.load %arg2[%c0_1, %c0_2] : memref<2296x8xbf16, #tpu.memory_space<vmem>>, vector<2296x8xbf16>
    %cst = arith.constant dense<0.000000e+00> : vector<2x8xf32>
    %3 = tpu.matmul %1, %2, %cst {dimension_numbers = #tpu.dot_dimension_numbers<[1], [0], [0], [1], [0, 0, 1, 1], [], []>} : vector<2x2296xbf16>, vector<2296x8xbf16>, vector<2x8xf32> -> vector<2x8xf32>
    %c0_3 = arith.constant 0 : index
    %c0_4 = arith.constant 0 : index
    %4 = vector.load %arg3[%c0_3, %c0_4] : memref<1x8xf32, #tpu.memory_space<vmem>>, vector<1x8xf32>
    %5 = vector.broadcast %4 : vector<1x8xf32> to vector<2x8xf32>
    %6 = arith.addf %3, %5 : vector<2x8xf32>
    %c0_5 = arith.constant 0 : index
    %c0_6 = arith.constant 0 : index
    %7 = vector.load %arg4[%c0_5, %c0_6] : memref<2x8xf32, #tpu.memory_space<vmem>>, vector<2x8xf32>
    tpu.vector_store %arg4[%c0_5, %c0_6], %6 {strides = array<i32>} : memref<2x8xf32, #tpu.memory_space<vmem>>, vector<2x8xf32>,
    return
  }
  func.func @transform_0(%arg0: i32) -> (i32, i32) {
    %c0_i32 = arith.constant 0 : i32
    %c0_i32_0 = arith.constant 0 : i32
    return %arg0, %c0_i32 : i32, i32
  }
  func.func @transform_1(%arg0: i32) -> (i32, i32) {
    %c0_i32 = arith.constant 0 : i32
    %c0_i32_0 = arith.constant 0 : i32
    %c0_i32_1 = arith.constant 0 : i32
    return %c0_i32, %c0_i32_0 : i32, i32
  }
  func.func @transform_2(%arg0: i32) -> (i32, i32) {
    %c0_i32 = arith.constant 0 : i32
    %c0_i32_0 = arith.constant 0 : i32
    %c0_i32_1 = arith.constant 0 : i32
    return %c0_i32, %c0_i32_0 : i32, i32
  }
  func.func @transform_3(%arg0: i32) -> (i32, i32) {
    %c0_i32 = arith.constant 0 : i32
    %c0_i32_0 = arith.constant 0 : i32
    return %arg0, %c0_i32 : i32, i32
  }
}

</mosaic_0001>

<bundles_post_ra>
// kernel: tpu_custom_call.1
= control target key start
LH: loop header
LB: loop body
LE: loop exit
PB: predicated region body
PF: predicated region fallthrough
CT: control target
= control target key end

     0   :  { %v30_v27 = vlaneseq  ;;  %v2197_v35 = vmov 1983009808   ;;  %s2691_s0 = inlined_call_operand.vmem [shape: f32[2,2296], index: 0, kind: input, shape index: {}]   ;;  %s2692_s1 = inlined_call_operand.vmem [shape: bf16[2296,8], index: 1, kind: input, shape index: {}]   ;;  %s2693_s2 = inlined_call_operand.vmem [shape: f32[1,8], index: 2, kind: input, shape index: {}]   ;;  %s2694_s3 = inlined_call_operand.hbm [shape: f32[2,8], index: 3, kind: output, shape index: {}]  }
   0x1   :  { %v2025_v0 = vld [vmem:[%s2692_s1 + $0x40] sm:$0xff]   ;;  %v2029_v4 = vld [vmem:[%s2692_s1 + $0x48] sm:$0xff]   ;;  %v2033_v8 = vld [vmem:[%s2692_s1 + $0x50] sm:$0xff]   ;;  %v28_v36 = vunpack.c.l.s4 %v2197_v35 }
   0x2   :  { %v2026_v1 = vld [vmem:[%s2692_s1] sm:$0xff]   ;;  %1824 = vmatprep.subr.bf16.mxu0 %v2025_v0  ;;  %v2030_v5 = vld [vmem:[%s2692_s1 + $0x8] sm:$0xff]   ;;  %v2034_v9 = vld [vmem:[%s2692_s1 + $0x10] sm:$0xff]   ;;  %v31_v32 = vshrl.u32 %v30_v27, 7 }
   0x3   :  { %v2027_v2 = vld [vmem:[%s2692_s1 + $0xc0] sm:$0xff]   ;;  %1825 = vmatpush3.bf16.msra.mxu0 %v2026_v1  ;;  %v2031_v6 = vld [vmem:[%s2692_s1 + $0xc8] sm:$0xff]   ;;  %v2035_v10 = vld [vmem:[%s2692_s1 + $0xd0] sm:$0xff]   ;;  %v29_v38 = vunpack.c.0.s8 %v28_v36 }
   0x4   :  { %v2028_v3 = vld [vmem:[%s2692_s1 + $0x80] sm:$0xff]   ;;  %1846 = vmatprep.subr.bf16.mxu1 %v2027_v2  ;;  %1826 = vmatprep.subr.bf16.mxu0 %v2029_v4  ;;  %v2032_v7 = vld [vmem:[%s2692_s1 + $0x88] sm:$0xff]   ;;  %v2036_v11 = vld [vmem:[%s2692_s1 + $0x90] sm:$0xff]  }
   0x5   :  { %1847 = vmatpush3.bf16.msra.mxu1 %v2028_v3  ;;  %v2037_v12 = vld [vmem:[%s2692_s1 + $0x58] sm:$0xff]   ;;  %v2041_v16 = vld [vmem:[%s2692_s1 + $0x60] sm:$0xff]   ;;  %v2045_v20 = vld [vmem:[%s2692_s1 + $0x68] sm:$0xff]   ;;  %v2324_v41 = vsub.s32 %v29_v38, %v31_v32 }
   0x6   :  { %1848 = vmatprep.subr.bf16.mxu1 %v2031_v6  ;;  %v2038_v13 = vld [vmem:[%s2692_s1 + $0x18] sm:$0xff]   ;;  %v2042_v17 = vld [vmem:[%s2692_s1 + $0x20] sm:$0xff]   ;;  %v2046_v21 = vld [vmem:[%s2692_s1 + $0x28] sm:$0xff]  }
   0x7   :  { %1827 = vmatpush3.bf16.msra.mxu0 %v2030_v5  ;;  %v2039_v14 = vld [vmem:[%s2692_s1 + $0xd8] sm:$0xff]   ;;  %v2043_v18 = vld [vmem:[%s2692_s1 + $0xe0] sm:$0xff]   ;;  %v2047_v22 = vld [vmem:[%s2692_s1 + $0xe8] sm:$0xff]  }
   0x8   :  { %1828 = vmatprep.subr.bf16.mxu0 %v2033_v8  ;;  %v2040_v15 = vld [vmem:[%s2692_s1 + $0x98] sm:$0xff]   ;;  %v2044_v19 = vld [vmem:[%s2692_s1 + $0xa0] sm:$0xff]   ;;  %v2048_v23 = vld [vmem:[%s2692_s1 + $0xa8] sm:$0xff]  }
   0x9   :  { %1849 = vmatpush3.bf16.msra.mxu1 %v2032_v7  ;;  %v2049_v24 = vld [vmem:[%s2692_s1 + $0x70] sm:$0xff]   ;;  %v2053_v29 = vld [vmem:[%s2692_s1 + $0x78] sm:$0xff]   ;;  %v16_v33 = vld [vmem:[%s2691_s0] sm:$0xff] }
   0xa   :  { %1850 = vmatprep.subr.bf16.mxu1 %v2035_v10  ;;  %v2050_v25 = vld [vmem:[%s2692_s1 + $0x30] sm:$0xff]   ;;  %v2054_v30 = vld [vmem:[%s2692_s1 + $0x38] sm:$0xff]   ;;  %v2057_v37 = vld [vmem:[%s2692_s1 + $0x140] sm:$0xff]   ;;  %v26_v39 = vcombine.high %v16_v33, %v16_v33  ;;  %v33_v42 = vrot.slane %v16_v33, %v2324_v41 }
   0xb   :  { %1829 = vmatpush3.bf16.msra.mxu0 %v2034_v9  ;;  %v2051_v26 = vld [vmem:[%s2692_s1 + $0xf0] sm:$0xff]   ;;  %v2055_v31 = vld [vmem:[%s2692_s1 + $0xf8] sm:$0xff]   ;;  %v2060_v40 = vld [vmem:[%s2692_s1 + $0x1c0] sm:$0xff]  }
   0xc   :  { %1830 = vmatprep.subr.bf16.mxu0 %v2037_v12  ;;  %v2052_v28 = vld [vmem:[%s2692_s1 + $0xb0] sm:$0xff]   ;;  %v2056_v34 = vld [vmem:[%s2692_s1 + $0xb8] sm:$0xff]   ;;  %v40_v43 = vrot.slane %v26_v39, %v2324_v41  ;;  %v41_v44 = vcombine.high %v33_v42, %v33_v42  ;;  %v2059_v46 = vld [vmem:[%s2692_s1 + $0x100] sm:$0xff]   ;;  %v120_v47 = vpack.c.bf16 %v33_v42, %v33_v42 }
   0xd   :  { %1851 = vmatpush3.bf16.msra.mxu1 %v2036_v11  ;;  %v2061_v49 = vld [vmem:[%s2692_s1 + $0x180] sm:$0xff]   ;;  %v2062_v52 = vld [vmem:[%s2692_s1 + $0x148] sm:$0xff]   ;;  %v2066_v56 = vld [vmem:[%s2692_s1 + $0x150] sm:$0xff]  }
   0xe   :  { %1852 = vmatprep.subr.bf16.mxu1 %v2039_v14  ;;  %v42_v45 = vcombine.high %v40_v43, %v40_v43  ;;  %v122_v48 = vpack.c.bf16 %v40_v43, %v40_v43  ;;  %v121_v50 = vpack.c.bf16 %v41_v44, %v41_v44  ;;  %v2064_v53 = vld [vmem:[%s2692_s1 + $0x1c8] sm:$0xff]   ;;  %v2068_v57 = vld [vmem:[%s2692_s1 + $0x1d0] sm:$0xff]   ;;  %v2070_v60 = vld [vmem:[%s2692_s1 + $0x158] sm:$0xff]  }
   0xf   :  { %1831 = vmatpush3.bf16.msra.mxu0 %v2038_v13  ;;  %v2063_v54 = vld [vmem:[%s2692_s1 + $0x108] sm:$0xff]   ;;  %v2067_v58 = vld [vmem:[%s2692_s1 + $0x110] sm:$0xff]   ;;  %v2072_v61 = vld [vmem:[%s2692_s1 + $0x1d8] sm:$0xff]  }
  0x10   :  { %1832 = vmatprep.subr.bf16.mxu0 %v2041_v16  ;;  %v123_v51 = vpack.c.bf16 %v42_v45, %v42_v45  ;;  %1333 = vmatprep.mubr.bf16.mxu0 %v121_v50  ;;  %v2065_v55 = vld [vmem:[%s2692_s1 + $0x188] sm:$0xff]   ;;  %v2069_v59 = vld [vmem:[%s2692_s1 + $0x190] sm:$0xff]   ;;  %v2071_v62 = vld [vmem:[%s2692_s1 + $0x118] sm:$0xff]  }
  0x11   :  { %1853 = vmatpush3.bf16.msra.mxu1 %v2040_v15  ;;  %v2073_v63 = vld [vmem:[%s2692_s1 + $0x198] sm:$0xff]   ;;  %v2074_v0 = vld [vmem:[%s2692_s1 + $0x160] sm:$0xff]   ;;  %v2078_v4 = vld [vmem:[%s2692_s1 + $0x168] sm:$0xff]  }
  0x12   :  { %1854 = vmatprep.subr.bf16.mxu1 %v2043_v18  ;;  %1373 = vmatprep.mubr.bf16.mxu1 %v123_v51  ;;  %v2076_v1 = vld [vmem:[%s2692_s1 + $0x1e0] sm:$0xff]   ;;  %v2080_v5 = vld [vmem:[%s2692_s1 + $0x1e8] sm:$0xff]   ;;  %v2082_v8 = vld [vmem:[%s2692_s1 + $0x170] sm:$0xff]  }
  0x13   :  { %1833 = vmatpush3.bf16.msra.mxu0 %v2042_v17  ;;  %v2075_v2 = vld [vmem:[%s2692_s1 + $0x120] sm:$0xff]   ;;  %v2079_v6 = vld [vmem:[%s2692_s1 + $0x128] sm:$0xff]   ;;  %v2084_v9 = vld [vmem:[%s2692_s1 + $0x1f0] sm:$0xff]  }
  0x14   :  { %1834 = vmatprep.subr.bf16.mxu0 %v2045_v20  ;;  %v2077_v3 = vld [vmem:[%s2692_s1 + $0x1a0] sm:$0xff]   ;;  %v2081_v7 = vld [vmem:[%s2692_s1 + $0x1a8] sm:$0xff]   ;;  %v2083_v11 = vld [vmem:[%s2692_s1 + $0x130] sm:$0xff]  }
  0x15   :  { %1855 = vmatpush3.bf16.msra.mxu1 %v2044_v19  ;;  %v17_v10 = vld [vmem:[%s2691_s0 + $0x8] sm:$0xff]  ;;  %v2085_v14 = vld [vmem:[%s2692_s1 + $0x1b0] sm:$0xff]   ;;  %v2086_v15 = vld [vmem:[%s2692_s1 + $0x178] sm:$0xff]  }
  0x16   :  { %1856 = vmatprep.subr.bf16.mxu1 %v2047_v22  ;;  %v50_v12 = vrot.slane %v17_v10, %v2324_v41  ;;  %v43_v13 = vcombine.high %v17_v10, %v17_v10  ;;  %v2088_v18 = vld [vmem:[%s2692_s1 + $0x1f8] sm:$0xff]   ;;  %v2096_v32 = vld [vmem:[%s2692_s1 + $0x208] sm:$0xff]   ;;  %v2101_v35 = vld [vmem:[%s2692_s1 + $0x2d0] sm:$0xff]  }
  0x17   :  { %1835 = vmatpush3.bf16.msra.mxu0 %v2046_v21  ;;  %v2087_v19 = vld [vmem:[%s2692_s1 + $0x138] sm:$0xff]   ;;  %v2098_v33 = vld [vmem:[%s2692_s1 + $0x288] sm:$0xff]   ;;  %v2100_v36 = vld [vmem:[%s2692_s1 + $0x210] sm:$0xff]  }
  0x18   :  { %1836 = vmatprep.subr.bf16.mxu0 %v2049_v24  ;;  %v58_v16 = vcombine.high %v50_v12, %v50_v12  ;;  %v57_v17 = vrot.slane %v43_v13, %v2324_v41  ;;  %v2089_v22 = vld [vmem:[%s2692_s1 + $0x1b8] sm:$0xff]   ;;  %v124_v27 = vpack.c.bf16 %v50_v12, %v50_v12  ;;  %v2107_v43 = vld [vmem:[%s2692_s1 + $0x260] sm:$0xff]   ;;  %v2114_v50 = vld [vmem:[%s2692_s1 + $0x2a8] sm:$0xff]  }
  0x19   :  { %1857 = vmatpush3.bf16.msra.mxu1 %v2048_v23  ;;  %v2090_v23 = vld [vmem:[%s2692_s1 + $0x240] sm:$0xff]   ;;  %v2103_v38 = vld [vmem:[%s2692_s1 + $0x258] sm:$0xff]   ;;  %v2115_v51 = vld [vmem:[%s2692_s1 + $0x270] sm:$0xff]  }
  0x1a   :  { %1858 = vmatprep.subr.bf16.mxu1 %v2051_v26  ;;  %v125_v20 = vpack.c.bf16 %v58_v16, %v58_v16  ;;  %v59_v21 = vcombine.high %v57_v17, %v57_v17  ;;  %v2092_v26 = vld [vmem:[%s2692_s1 + $0x200] sm:$0xff]   ;;  %v2105_v39 = vld [vmem:[%s2692_s1 + $0x2d8] sm:$0xff]   ;;  %v2130_v10 = vld [vmem:[%s2692_s1 + $0x3c8] sm:$0xff]  }
  0x1b   :  { %1837 = vmatpush3.bf16.msra.mxu0 %v2050_v25  ;;  %v2093_v25 = vld [vmem:[%s2692_s1 + $0x2c0] sm:$0xff]   ;;  %v2106_v42 = vld [vmem:[%s2692_s1 + $0x298] sm:$0xff]   ;;  %v2131_v12 = vld [vmem:[%s2692_s1 + $0x388] sm:$0xff]  }
  0x1c   :  { %1838 = vmatprep.subr.bf16.mxu0 %v2053_v29  ;;  %v127_v24 = vpack.c.bf16 %v59_v21, %v59_v21  ;;  %v2094_v29 = vld [vmem:[%s2692_s1 + $0x280] sm:$0xff]   ;;  %v2132_v13 = vld [vmem:[%s2692_s1 + $0x350] sm:$0xff]  }
  0x1d   :  { %1859 = vmatpush3.bf16.msra.mxu1 %v2052_v28  ;;  %v126_v28 = vpack.c.bf16 %v57_v17, %v57_v17  ;;  %v2109_v44 = vld [vmem:[%s2692_s1 + $0x2e0] sm:$0xff]   ;;  %v2135_v16 = vld [vmem:[%s2692_s1 + $0x390] sm:$0xff]   ;;  %v2136_v17 = vld [vmem:[%s2692_s1 + $0x358] sm:$0xff]  }
  0x1e   :  { %1860 = vmatprep.subr.bf16.mxu1 %v2055_v31  ;;  %v2097_v31 = vld [vmem:[%s2692_s1 + $0x2c8] sm:$0xff]   ;;  %v2108_v45 = vld [vmem:[%s2692_s1 + $0x220] sm:$0xff]  }
  0x1f   :  { %1839 = vmatpush3.bf16.msra.mxu0 %v2054_v30  ;;  %v2095_v30 = vld [vmem:[%s2692_s1 + $0x248] sm:$0xff]   ;;  %v2140_v21 = vld [vmem:[%s2692_s1 + $0x360] sm:$0xff]  }
  0x20   :  { %1868 = vmatprep.subr.bf16.mxu0 %v2057_v37  ;;  %v2102_v37 = vld [vmem:[%s2692_s1 + $0x290] sm:$0xff]  }
  0x21   :  { %1861 = vmatpush3.bf16.msra.mxu1 %v2056_v34  ;;  %v2099_v34 = vld [vmem:[%s2692_s1 + $0x250] sm:$0xff]  }
  0x22   :  { %1890 = vmatprep.subr.bf16.mxu1 %v2060_v40  ;;  %1334 = vmatmul.mubr.bf16.vlgmr.msra.gmra.mrb[0].mxu0 %v120_v47  ;;  %v2104_v40 = vld [vmem:[%s2692_s1 + $0x218] sm:$0xff]   ;;  %v2111_v47 = vld [vmem:[%s2692_s1 + $0x268] sm:$0xff]  }
  0x23   :  { %1869 = vmatpush3.bf16.msra.mxu0 %v2059_v46  ;;  %1413 = vmatprep.mubr.bf16.mxu0 %v125_v20  ;;  %v2110_v46 = vld [vmem:[%s2692_s1 + $0x2a0] sm:$0xff]   ;;  %v2139_v20 = vld [vmem:[%s2692_s1 + $0x398] sm:$0xff]  }
  0x24   :  { %1374 = vmatmul.mubr.bf16.vlgmr.msra.gmra.mrb[0].mxu1 %v122_v48  ;;  %1870 = vmatprep.subr.bf16.mxu0 %v2062_v52  ;;  %v2113_v48 = vld [vmem:[%s2692_s1 + $0x2e8] sm:$0xff]   ;;  %v2117_v52 = vld [vmem:[%s2692_s1 + $0x2f0] sm:$0xff]  }
  0x25   :  { %1891 = vmatpush3.bf16.msra.mxu1 %v2061_v49  ;;  %1453 = vmatprep.mubr.bf16.mxu1 %v127_v24  ;;  %v2112_v49 = vld [vmem:[%s2692_s1 + $0x228] sm:$0xff]   ;;  %v2143_v24 = vld [vmem:[%s2692_s1 + $0x3a0] sm:$0xff]  }
  0x26   :  { %1892 = vmatprep.subr.bf16.mxu1 %v2064_v53  ;;  %v18_v53 = vld [vmem:[%s2691_s0 + $0x10] sm:$0xff] }
  0x27   :  { %1871 = vmatpush3.bf16.msra.mxu0 %v2063_v54  ;;  %v2116_v54 = vld [vmem:[%s2692_s1 + $0x230] sm:$0xff]  }
  0x28   :  { %1872 = vmatprep.subr.bf16.mxu0 %v2066_v56  ;;  %v60_v56 = vcombine.high %v18_v53, %v18_v53 }
  0x29   :  { %1893 = vmatpush3.bf16.msra.mxu1 %v2065_v55  ;;  %v67_v55 = vrot.slane %v18_v53, %v2324_v41  ;;  %v2162_v53 = vld [vmem:[%s2692_s1 + $0x410] sm:$0xff]  }
  0x2a   :  { %1894 = vmatprep.subr.bf16.mxu1 %v2068_v57  ;;  %v2118_v57 = vld [vmem:[%s2692_s1 + $0x2b0] sm:$0xff]  }
  0x2b   :  { %1873 = vmatpush3.bf16.msra.mxu0 %v2067_v58  ;;  %v2119_v58 = vld [vmem:[%s2692_s1 + $0x278] sm:$0xff]  }
  0x2c   :  { %1874 = vmatprep.subr.bf16.mxu0 %v2070_v60  ;;  %v74_v60 = vrot.slane %v60_v56, %v2324_v41 }
  0x2d   :  { %1895 = vmatpush3.bf16.msra.mxu1 %v2069_v59  ;;  %v75_v59 = vcombine.high %v67_v55, %v67_v55 }
  0x2e   :  { %1896 = vmatprep.subr.bf16.mxu1 %v2072_v61  ;;  %v2121_v61 = vld [vmem:[%s2692_s1 + $0x2f8] sm:$0xff]  }
  0x2f   :  { %1875 = vmatpush3.bf16.msra.mxu0 %v2071_v62  ;;  %v2120_v62 = vld [vmem:[%s2692_s1 + $0x238] sm:$0xff]  }
  0x30   :  { %1876 = vmatprep.subr.bf16.mxu0 %v2074_v0  ;;  %v76_v0 = vcombine.high %v74_v60, %v74_v60 }
  0x31   :  { %1897 = vmatpush3.bf16.msra.mxu1 %v2073_v63  ;;  %v129_v63 = vpack.c.bf16 %v75_v59, %v75_v59 }
  0x32   :  { %1898 = vmatprep.subr.bf16.mxu1 %v2076_v1  ;;  %v2122_v1 = vld [vmem:[%s2692_s1 + $0x2b8] sm:$0xff]  }
  0x33   :  { %1877 = vmatpush3.bf16.msra.mxu0 %v2075_v2  ;;  %v2123_v2 = vld [vmem:[%s2692_s1 + $0x340] sm:$0xff]  }
  0x34   :  { %1878 = vmatprep.subr.bf16.mxu0 %v2078_v4  ;;  %v2126_v4 = vld [vmem:[%s2692_s1 + $0x3c0] sm:$0xff]  }
  0x35   :  { %1899 = vmatpush3.bf16.msra.mxu1 %v2077_v3  ;;  %v131_v3 = vpack.c.bf16 %v76_v0, %v76_v0 }
  0x36   :  { %1900 = vmatprep.subr.bf16.mxu1 %v2080_v5  ;;  %v2125_v5 = vld [vmem:[%s2692_s1 + $0x300] sm:$0xff]  }
  0x37   :  { %1879 = vmatpush3.bf16.msra.mxu0 %v2079_v6  ;;  %v128_v6 = vpack.c.bf16 %v67_v55, %v67_v55 }
  0x38   :  { %1880 = vmatprep.subr.bf16.mxu0 %v2082_v8  ;;  %v2127_v8 = vld [vmem:[%s2692_s1 + $0x380] sm:$0xff]  }
  0x39   :  { %1901 = vmatpush3.bf16.msra.mxu1 %v2081_v7  ;;  %v130_v7 = vpack.c.bf16 %v74_v60, %v74_v60 }
  0x3a   :  { %1902 = vmatprep.subr.bf16.mxu1 %v2084_v9  ;;  %v2128_v9 = vld [vmem:[%s2692_s1 + $0x348] sm:$0xff]  }
  0x3b   :  { %1881 = vmatpush3.bf16.msra.mxu0 %v2083_v11  ;;  %v2129_v11 = vld [vmem:[%s2692_s1 + $0x308] sm:$0xff]  }
  0x3c   :  { %1882 = vmatprep.subr.bf16.mxu0 %v2086_v15  ;;  %v2133_v15 = vld [vmem:[%s2692_s1 + $0x310] sm:$0xff]  }
  0x3d   :  { %1903 = vmatpush3.bf16.msra.mxu1 %v2085_v14  ;;  %v2134_v14 = vld [vmem:[%s2692_s1 + $0x3d0] sm:$0xff]  }
  0x3e   :  { %1904 = vmatprep.subr.bf16.mxu1 %v2088_v18  ;;  %v2138_v18 = vld [vmem:[%s2692_s1 + $0x3d8] sm:$0xff]  }
  0x3f   :  { %1883 = vmatpush3.bf16.msra.mxu0 %v2087_v19  ;;  %v2137_v19 = vld [vmem:[%s2692_s1 + $0x318] sm:$0xff]  }
  0x40   :  { %1912 = vmatprep.subr.bf16.mxu0 %v2090_v23  ;;  %v2141_v23 = vld [vmem:[%s2692_s1 + $0x320] sm:$0xff]  }
  0x41   :  { %1905 = vmatpush3.bf16.msra.mxu1 %v2089_v22  ;;  %v2142_v22 = vld [vmem:[%s2692_s1 + $0x3e0] sm:$0xff]  }
  0x42   :  { %1934 = vmatprep.subr.bf16.mxu1 %v2093_v25  ;;  %1414 = vmatmul.mubr.bf16.vlgmr.msra.gmra.mrb[4].mxu0 %v124_v27  ;;  %v2144_v25 = vld [vmem:[%s2692_s1 + $0x368] sm:$0xff]  }
  0x43   :  { %1913 = vmatpush3.bf16.msra.mxu0 %v2092_v26  ;;  %1493 = vmatprep.mubr.bf16.mxu0 %v129_v63  ;;  %v2146_v26 = vld [vmem:[%s2692_s1 + $0x3e8] sm:$0xff]  }
  0x44   :  { %1454 = vmatmul.mubr.bf16.vlgmr.msra.gmra.mrb[4].mxu1 %v126_v28  ;;  %1914 = vmatprep.subr.bf16.mxu0 %v2095_v30  ;;  %v2145_v27 = vld [vmem:[%s2692_s1 + $0x328] sm:$0xff]   ;;  %v2150_v30 = vld [vmem:[%s2692_s1 + $0x3f0] sm:$0xff]  }
  0x45   :  { %1935 = vmatpush3.bf16.msra.mxu1 %v2094_v29  ;;  %1533 = vmatprep.mubr.bf16.mxu1 %v131_v3  ;;  %v2147_v28 = vld [vmem:[%s2692_s1 + $0x3a8] sm:$0xff]   ;;  %v2148_v29 = vld [vmem:[%s2692_s1 + $0x370] sm:$0xff]  }
  0x46   :  { %1936 = vmatprep.subr.bf16.mxu1 %v2097_v31  ;;  %v2149_v31 = vld [vmem:[%s2692_s1 + $0x330] sm:$0xff]  }
  0x47   :  { %1915 = vmatpush3.bf16.msra.mxu0 %v2096_v32  ;;  %v19_v32 = vld [vmem:[%s2691_s0 + $0x18] sm:$0xff] }
  0x48   :  { %1916 = vmatprep.subr.bf16.mxu0 %v2099_v34  ;;  %v84_v34 = vrot.slane %v19_v32, %v2324_v41 }
  0x49   :  { %1937 = vmatpush3.bf16.msra.mxu1 %v2098_v33  ;;  %v2151_v33 = vld [vmem:[%s2692_s1 + $0x3b0] sm:$0xff]  }
  0x4a   :  { %1938 = vmatprep.subr.bf16.mxu1 %v2101_v35  ;;  %v77_v35 = vcombine.high %v19_v32, %v19_v32 }
  0x4b   :  { %1917 = vmatpush3.bf16.msra.mxu0 %v2100_v36  ;;  %v2152_v36 = vld [vmem:[%s2692_s1 + $0x378] sm:$0xff]  }
  0x4c   :  { %1918 = vmatprep.subr.bf16.mxu0 %v2103_v38  ;;  %v92_v38 = vcombine.high %v84_v34, %v84_v34 }
  0x4d   :  { %1939 = vmatpush3.bf16.msra.mxu1 %v2102_v37  ;;  %v2154_v37 = vld [vmem:[%s2692_s1 + $0x3f8] sm:$0xff]  }
  0x4e   :  { %1940 = vmatprep.subr.bf16.mxu1 %v2105_v39  ;;  %v91_v39 = vrot.slane %v77_v35, %v2324_v41  ;;  %v132_v41 = vpack.c.bf16 %v84_v34, %v84_v34 }
  0x4f   :  { %1919 = vmatpush3.bf16.msra.mxu0 %v2104_v40  ;;  %v2153_v40 = vld [vmem:[%s2692_s1 + $0x338] sm:$0xff]  }
  0x50   :  { %1920 = vmatprep.subr.bf16.mxu0 %v2107_v43  ;;  %v93_v43 = vcombine.high %v91_v39, %v91_v39 }
  0x51   :  { %1941 = vmatpush3.bf16.msra.mxu1 %v2106_v42  ;;  %v133_v42 = vpack.c.bf16 %v92_v38, %v92_v38 }
  0x52   :  { %1942 = vmatprep.subr.bf16.mxu1 %v2109_v44  ;;  %v2155_v44 = vld [vmem:[%s2692_s1 + $0x3b8] sm:$0xff]  }
  0x53   :  { %1921 = vmatpush3.bf16.msra.mxu0 %v2108_v45  ;;  %v2156_v45 = vld [vmem:[%s2692_s1 + $0x440] sm:$0xff]  }
  0x54   :  { %1922 = vmatprep.subr.bf16.mxu0 %v2111_v47  ;;  %v134_v47 = vpack.c.bf16 %v91_v39, %v91_v39 }
  0x55   :  { %1943 = vmatpush3.bf16.msra.mxu1 %v2110_v46  ;;  %v135_v46 = vpack.c.bf16 %v93_v43, %v93_v43 }
  0x56   :  { %1944 = vmatprep.subr.bf16.mxu1 %v2113_v48  ;;  %v2158_v48 = vld [vmem:[%s2692_s1 + $0x400] sm:$0xff]  }
  0x57   :  { %1923 = vmatpush3.bf16.msra.mxu0 %v2112_v49  ;;  %v2159_v49 = vld [vmem:[%s2692_s1 + $0x448] sm:$0xff]  }
  0x58   :  { %1924 = vmatprep.subr.bf16.mxu0 %v2115_v51  ;;  %v2161_v51 = vld [vmem:[%s2692_s1 + $0x450] sm:$0xff]  }
  0x59   :  { %1945 = vmatpush3.bf16.msra.mxu1 %v2114_v50  ;;  %v2160_v50 = vld [vmem:[%s2692_s1 + $0x408] sm:$0xff]  }
  0x5a   :  { %1946 = vmatprep.subr.bf16.mxu1 %v2117_v52  ;;  %v1677_v52 = vld.sshfl [vmem:[%s2691_s0 + $0x20] sm:$0x33 pattern:$0x76325410] }
  0x5b   :  { %1925 = vmatpush3.bf16.msra.mxu0 %v2116_v54  ;;  %v101_v54 = vcombine.high %v1677_v52, %v1677_v52 }
  0x5c   :  { %1926 = vmatprep.subr.bf16.mxu0 %v2119_v58 }
  0x5d   :  { %1947 = vmatpush3.bf16.msra.mxu1 %v2118_v57 }
  0x5e   :  { %1948 = vmatprep.subr.bf16.mxu1 %v2121_v61 }
  0x5f   :  { %1927 = vmatpush3.bf16.msra.mxu0 %v2120_v62 }
  0x60   :  { %1956 = vmatprep.subr.bf16.mxu0 %v2123_v2 }
  0x61   :  { %1949 = vmatpush3.bf16.msra.mxu1 %v2122_v1 }
  0x62   :  { %1978 = vmatprep.subr.bf16.mxu1 %v2126_v4  ;;  %1494 = vmatmul.mubr.bf16.vlgmr.msra.gmra.mrb[8].mxu0 %v128_v6 }
  0x63   :  { %1957 = vmatpush3.bf16.msra.mxu0 %v2125_v5  ;;  %1573 = vmatprep.mubr.bf16.mxu0 %v133_v42 }
  0x64   :  { %1534 = vmatmul.mubr.bf16.vlgmr.msra.gmra.mrb[8].mxu1 %v130_v7  ;;  %1958 = vmatprep.subr.bf16.mxu0 %v2128_v9 }
  0x65   :  { %1979 = vmatpush3.bf16.msra.mxu1 %v2127_v8  ;;  %1613 = vmatprep.mubr.bf16.mxu1 %v135_v46 }
  0x66   :  { %1980 = vmatprep.subr.bf16.mxu1 %v2130_v10 }
  0x67   :  { %1959 = vmatpush3.bf16.msra.mxu0 %v2129_v11 }
  0x68   :  { %1960 = vmatprep.subr.bf16.mxu0 %v2132_v13 }
  0x69   :  { %1981 = vmatpush3.bf16.msra.mxu1 %v2131_v12 }
  0x6a   :  { %1982 = vmatprep.subr.bf16.mxu1 %v2134_v14 }
  0x6b   :  { %1961 = vmatpush3.bf16.msra.mxu0 %v2133_v15 }
  0x6c   :  { %1962 = vmatprep.subr.bf16.mxu0 %v2136_v17 }
  0x6d   :  { %1983 = vmatpush3.bf16.msra.mxu1 %v2135_v16 }
  0x6e   :  { %1984 = vmatprep.subr.bf16.mxu1 %v2138_v18 }
  0x6f   :  { %1963 = vmatpush3.bf16.msra.mxu0 %v2137_v19 }
  0x70   :  { %1964 = vmatprep.subr.bf16.mxu0 %v2140_v21 }
  0x71   :  { %1985 = vmatpush3.bf16.msra.mxu1 %v2139_v20 }
  0x72   :  { %1986 = vmatprep.subr.bf16.mxu1 %v2142_v22 }
  0x73   :  { %1965 = vmatpush3.bf16.msra.mxu0 %v2141_v23 }
  0x74   :  { %1966 = vmatprep.subr.bf16.mxu0 %v2144_v25 }
  0x75   :  { %1987 = vmatpush3.bf16.msra.mxu1 %v2143_v24 }
  0x76   :  { %1988 = vmatprep.subr.bf16.mxu1 %v2146_v26 }
  0x77   :  { %1967 = vmatpush3.bf16.msra.mxu0 %v2145_v27 }
  0x78   :  { %1968 = vmatprep.subr.bf16.mxu0 %v2148_v29 }
  0x79   :  { %1989 = vmatpush3.bf16.msra.mxu1 %v2147_v28 }
  0x7a   :  { %1990 = vmatprep.subr.bf16.mxu1 %v2150_v30 }
  0x7b   :  { %1969 = vmatpush3.bf16.msra.mxu0 %v2149_v31 }
  0x7c   :  { %1970 = vmatprep.subr.bf16.mxu0 %v2152_v36 }
  0x7d   :  { %1991 = vmatpush3.bf16.msra.mxu1 %v2151_v33 }
  0x7e   :  { %1992 = vmatprep.subr.bf16.mxu1 %v2154_v37 }
  0x7f   :  { %1971 = vmatpush3.bf16.msra.mxu0 %v2153_v40 }
  0x80   :  { %2000 = vmatprep.subr.bf16.mxu0 %v2156_v45 }
  0x81   :  { %1993 = vmatpush3.bf16.msra.mxu1 %v2155_v44 }
  0x82   :  { %1574 = vmatmul.mubr.bf16.vlgmr.msra.gmra.mrb[12].mxu0 %v132_v41 }
  0x83   :  { %2001 = vmatpush3.bf16.msra.mxu0 %v2158_v48 }
  0x84   :  { %1614 = vmatmul.mubr.bf16.vlgmr.msra.gmra.mrb[12].mxu1 %v134_v47  ;;  %2002 = vmatprep.subr.bf16.mxu0 %v2159_v49 }
  0x87   :  { %2003 = vmatpush3.bf16.msra.mxu0 %v2160_v50 }
  0x88   :  { %8 = vsyncpa [#allocation3], 0  ;;  %2004 = vmatprep.subr.bf16.mxu0 %v2161_v51  ;;  %v2163_v55 = vld [vmem:[%s2692_s1 + $0x458] sm:$0xff]   ;;  %vm1293_vm0 = vcmask 982016   ;;  %v137_v56 = vpack.c.bf16 %v101_v54, %v101_v54  ;;  %v2165_v58 = vld [vmem:[%s2692_s1 + $0x460] sm:$0xff]   ;;  %vm1297_vm1 = vcmask 1043456   ;;  %v136_v2 = vpack.c.bf16 %v1677_v52, %v1677_v52 }
  0x89   :  { %v2164_v57 = vld [vmem:[%s2692_s1 + $0x418] sm:$0xff]   ;;  %v2166_v59 = vld [vmem:[%s2692_s1 + $0x420] sm:$0xff]   ;;  %v2167_v60 = vld [vmem:[%s2692_s1 + $0x468] sm:$0xff]   ;;  %vm1661_vm2 = vcmask 58368  }
  0x8a   :  { %1823 = vmatprep.mubr.msk.bf16.mxu0 %vm1293_vm0, %v137_v56  ;;  %v2168_v61 = vld [vmem:[%s2692_s1 + $0x428] sm:$0xff]   ;;  %v2169_v62 = vld [vmem:[%s2692_s1 + $0x470] sm:$0xff]   ;;  %v2171_v0 = vld [vmem:[%s2692_s1 + $0x478] ss:$0 sps:$4 sm:$0xff]  }
  0x8b   :  { %2005 = vmatpush3.bf16.msra.mxu0 %v2162_v53  ;;  %v2170_v63 = vld [vmem:[%s2692_s1 + $0x430] sm:$0xff]   ;;  %v2172_v1 = vld [vmem:[%s2692_s1 + $0x438] sm:$0xff]   ;;  %v1678_v5 = vld [vmem:[%s2693_s2] ss:$0 sm:$0xff]  ;;  %s2198_s1 = smov [#allocation2]  }
  0x8c   :  { %2006 = vmatprep.subr.bf16.mxu0 %v2163_v55  ;;  %s1669_s2 = sshll.u32 %s2198_s1, 4  ;;  %s1670_s2 = int_to_ptr.vmem [resolvable:$true] %s1669_s2 }
  0x8d   :  { %s2173_s14 = scalar_lea.vmem %s1670_s2, 32  ;;  %p2178_p1 = scmp.lt.s32.totalorder %s1670_s2, %s1670_s2 }
  0x8e   :  { %p2174_p0 = scmp.ne.s32.totalorder %s1670_s2, %s2173_s14  ;;  %p2179_p2 = scmp.lt.s32.totalorder %s2173_s14, %s2173_s14 }
  0x8f   :  { %2007 = vmatpush3.bf16.msra.mxu0 %v2164_v57 }
  0x90   :  { %2008 = vmatprep.subr.bf16.mxu0 %v2165_v58  ;;  %p2180_p3 = por %p2179_p2, %p2178_p1 }
  0x92   :  { %p2181_p4 = pnand %p2180_p3, %p2174_p0 }
  0x93   :  { %2009 = vmatpush3.bf16.msra.mxu0 %v2166_v59 }
  0x94   :  { %2010 = vmatprep.subr.bf16.mxu0 %v2167_v60 }
  0x97   :  { %2011 = vmatpush3.bf16.msra.mxu0 %v2168_v61 }
  0x98   :  { %2012 = vmatprep.subr.bf16.mxu0 %v2169_v62 }
  0x9b   :  { %2013 = vmatpush3.bf16.msra.mxu0 %v2170_v63 }
  0x9c   :  { %2022 = vmatprep.subr.msk.bf16.mxu0 %vm1297_vm1, %v2171_v0 }
  0x9f   :  { %2015 = vmatpush3.bf16.msra.mxu0 %v2172_v1 }
  0xa2   :  { %1654 = vmatmul.mubr.bf16.vlgmr.msra.gmra.mrb[16].mxu0 %v136_v2 }
  0xf5   :  { %v1840_v3 = vpop.f32.mrb[0].mxu0 }
  0xf6   :  { %v1841_v6 = vpop.f32.mrb[1].mxu0 }
  0xf7   :  { %v1862_v4 = vpop.f32.mrb[0].mxu1  ;;  %v1842_v8 = vadd.f32 %v1841_v6, %v1840_v3  ;;  %v1843_v9 = vpop.f32.mrb[2].mxu0 }
  0xf8   :  { %v1863_v7 = vpop.f32.mrb[1].mxu1  ;;  %v1844_v12 = vpop.f32.mrb[3].mxu0 }
  0xf9   :  { %v1864_v10 = vadd.f32 %v1863_v7, %v1862_v4  ;;  %v1865_v11 = vpop.f32.mrb[2].mxu1  ;;  %v1336_v14 = vadd.f32 %v1842_v8, %v1678_v5 }
  0xfa   :  { %v1866_v13 = vpop.f32.mrb[3].mxu1 }
  0xfb   :  { %v1376_v15 = vadd.f32 %v1864_v10, %v1336_v14 }
 0x115   :  { %v1884_v16 = vpop.f32.mrb[4].mxu0 }
 0x116   :  { %v1885_v18 = vpop.f32.mrb[5].mxu0 }
 0x117   :  { %v1906_v17 = vpop.f32.mrb[4].mxu1  ;;  %v1886_v20 = vadd.f32 %v1885_v18, %v1884_v16  ;;  %v1887_v21 = vpop.f32.mrb[6].mxu0 }
 0x118   :  { %v1907_v19 = vpop.f32.mrb[5].mxu1  ;;  %v1888_v24 = vpop.f32.mrb[7].mxu0 }
 0x119   :  { %v1908_v22 = vadd.f32 %v1907_v19, %v1906_v17  ;;  %v1909_v23 = vpop.f32.mrb[6].mxu1  ;;  %v1416_v26 = vadd.f32 %v1886_v20, %v1376_v15 }
 0x11a   :  { %v1910_v25 = vpop.f32.mrb[7].mxu1 }
 0x11b   :  { %v1456_v27 = vadd.f32 %v1908_v22, %v1416_v26 }
 0x135   :  { %v1928_v28 = vpop.f32.mrb[8].mxu0 }
 0x136   :  { %v1929_v30 = vpop.f32.mrb[9].mxu0 }
 0x137   :  { %v1950_v29 = vpop.f32.mrb[8].mxu1  ;;  %v1930_v32 = vadd.f32 %v1929_v30, %v1928_v28  ;;  %v1931_v33 = vpop.f32.mrb[10].mxu0 }
 0x138   :  { %v1951_v31 = vpop.f32.mrb[9].mxu1  ;;  %v1932_v36 = vpop.f32.mrb[11].mxu0 }
 0x139   :  { %v1952_v34 = vadd.f32 %v1951_v31, %v1950_v29  ;;  %v1953_v35 = vpop.f32.mrb[10].mxu1  ;;  %v1496_v38 = vadd.f32 %v1930_v32, %v1456_v27 }
 0x13a   :  { %v1954_v37 = vpop.f32.mrb[11].mxu1 }
 0x13b   :  { %v1536_v39 = vadd.f32 %v1952_v34, %v1496_v38 }
 0x155   :  { %v1972_v40 = vpop.f32.mrb[12].mxu0 }
 0x156   :  { %v1973_v43 = vpop.f32.mrb[13].mxu0 }
 0x157   :  { %v1994_v42 = vpop.f32.mrb[12].mxu1  ;;  %v1974_v45 = vadd.f32 %v1973_v43, %v1972_v40  ;;  %v1975_v46 = vpop.f32.mrb[14].mxu0 }
 0x158   :  { %v1995_v44 = vpop.f32.mrb[13].mxu1  ;;  %v1976_v48 = vpop.f32.mrb[15].mxu0 }
 0x159   :  { %v1996_v41 = vadd.f32 %v1995_v44, %v1994_v42  ;;  %v1997_v47 = vpop.f32.mrb[14].mxu1  ;;  %v1576_v50 = vadd.f32 %v1974_v45, %v1536_v39 }
 0x15a   :  { %v1998_v49 = vpop.f32.mrb[15].mxu1 }
 0x15b   :  { %v1616_v51 = vadd.f32 %v1996_v41, %v1576_v50 }
 0x175   :  { %v2016_v52 = vpop.f32.mrb[16].mxu0 }
 0x176   :  { %v2017_v53 = vpop.f32.mrb[17].mxu0 }
 0x177   :  { %v2018_v54 = vadd.f32 %v2017_v53, %v2016_v52  ;;  %v2019_v55 = vpop.f32.mrb[18].mxu0 }
 0x178   :  { %v2020_v56 = vpop.f32.mrb[19].mxu0 }
 0x179   :  { %v1656_v57 = vadd.f32 %v2018_v54, %v1616_v51 }
 0x17b   :  { %1662 = vst.msk [vmem:[#allocation2] sm:$0x3] %vm1661_vm2, %v1656_v57 }
 0x17c   :  { %2184 = shalt.err (!%p2181_p4)
}
 0x17d   :  { %s2185_s17 = scalar_lea.hbm %s2694_s3, 32 }
 0x17e   :  { %p2186_p5 = scmp.ne.s32.totalorder %s2694_s3, %s2185_s17  ;;  %p2189_p6 = scmp.lt.u32.totalorder %s2185_s17, %s2694_s3 }
 0x180   :  { %p2191_p7 = pnand %p2189_p6, %p2186_p5 }
 0x182   :  { %2194 = shalt.err (!%p2191_p7)
}
 0x183   :  { %1672 = dma.vmem_to_hbm [thread:$0]  %s1670_s2, 32, %s2694_s3, [#allocation3]  }
 0x184   :  { %2195 = dma.done.wait [#allocation3], 32  }
 0x185   :  { %2196 = vsyncadd [#allocation3], 4294967264 }
 0x186   :  { %1676 = vsyncpa [#allocation3], 1 }

// kernel: tpu_custom_call.1
= control target key start
LH: loop header
LB: loop body
LE: loop exit
PB: predicated region body
PF: predicated region fallthrough
CT: control target
= control target key end

     0   :  { %v30_v27 = vlaneseq  ;;  %v2197_v35 = vmov 1983009808   ;;  %s2691_s0 = inlined_call_operand.vmem [shape: f32[2,2296], index: 0, kind: input, shape index: {}]   ;;  %s2692_s1 = inlined_call_operand.vmem [shape: bf16[2296,8], index: 1, kind: input, shape index: {}]   ;;  %s2693_s2 = inlined_call_operand.vmem [shape: f32[1,8], index: 2, kind: input, shape index: {}]   ;;  %s2694_s3 = inlined_call_operand.hbm [shape: f32[2,8], index: 3, kind: output, shape index: {}]  }
   0x1   :  { %v2025_v0 = vld [vmem:[%s2692_s1 + $0x40] sm:$0xff]   ;;  %v2029_v4 = vld [vmem:[%s2692_s1 + $0x48] sm:$0xff]   ;;  %v2033_v8 = vld [vmem:[%s2692_s1 + $0x50] sm:$0xff]   ;;  %v28_v36 = vunpack.c.l.s4 %v2197_v35 }
   0x2   :  { %v2026_v1 = vld [vmem:[%s2692_s1] sm:$0xff]   ;;  %1824 = vmatprep.subr.bf16.mxu0 %v2025_v0  ;;  %v2030_v5 = vld [vmem:[%s2692_s1 + $0x8] sm:$0xff]   ;;  %v2034_v9 = vld [vmem:[%s2692_s1 + $0x10] sm:$0xff]   ;;  %v31_v32 = vshrl.u32 %v30_v27, 7 }
   0x3   :  { %v2027_v2 = vld [vmem:[%s2692_s1 + $0xc0] sm:$0xff]   ;;  %1825 = vmatpush3.bf16.msra.mxu0 %v2026_v1  ;;  %v2031_v6 = vld [vmem:[%s2692_s1 + $0xc8] sm:$0xff]   ;;  %v2035_v10 = vld [vmem:[%s2692_s1 + $0xd0] sm:$0xff]   ;;  %v29_v38 = vunpack.c.0.s8 %v28_v36 }
   0x4   :  { %v2028_v3 = vld [vmem:[%s2692_s1 + $0x80] sm:$0xff]   ;;  %1846 = vmatprep.subr.bf16.mxu1 %v2027_v2  ;;  %1826 = vmatprep.subr.bf16.mxu0 %v2029_v4  ;;  %v2032_v7 = vld [vmem:[%s2692_s1 + $0x88] sm:$0xff]   ;;  %v2036_v11 = vld [vmem:[%s2692_s1 + $0x90] sm:$0xff]  }
   0x5   :  { %1847 = vmatpush3.bf16.msra.mxu1 %v2028_v3  ;;  %v2037_v12 = vld [vmem:[%s2692_s1 + $0x58] sm:$0xff]   ;;  %v2041_v16 = vld [vmem:[%s2692_s1 + $0x60] sm:$0xff]   ;;  %v2045_v20 = vld [vmem:[%s2692_s1 + $0x68] sm:$0xff]   ;;  %v2324_v41 = vsub.s32 %v29_v38, %v31_v32 }
   0x6   :  { %1848 = vmatprep.subr.bf16.mxu1 %v2031_v6  ;;  %v2038_v13 = vld [vmem:[%s2692_s1 + $0x18] sm:$0xff]   ;;  %v2042_v17 = vld [vmem:[%s2692_s1 + $0x20] sm:$0xff]   ;;  %v2046_v21 = vld [vmem:[%s2692_s1 + $0x28] sm:$0xff]  }
   0x7   :  { %1827 = vmatpush3.bf16.msra.mxu0 %v2030_v5  ;;  %v2039_v14 = vld [vmem:[%s2692_s1 + $0xd8] sm:$0xff]   ;;  %v2043_v18 = vld [vmem:[%s2692_s1 + $0xe0] sm:$0xff]   ;;  %v2047_v22 = vld [vmem:[%s2692_s1 + $0xe8] sm:$0xff]  }
   0x8   :  { %1828 = vmatprep.subr.bf16.mxu0 %v2033_v8  ;;  %v2040_v15 = vld [vmem:[%s2692_s1 + $0x98] sm:$0xff]   ;;  %v2044_v19 = vld [vmem:[%s2692_s1 + $0xa0] sm:$0xff]   ;;  %v2048_v23 = vld [vmem:[%s2692_s1 + $0xa8] sm:$0xff]  }
   0x9   :  { %1849 = vmatpush3.bf16.msra.mxu1 %v2032_v7  ;;  %v2049_v24 = vld [vmem:[%s2692_s1 + $0x70] sm:$0xff]   ;;  %v2053_v29 = vld [vmem:[%s2692_s1 + $0x78] sm:$0xff]   ;;  %v16_v33 = vld [vmem:[%s2691_s0] sm:$0xff] }
   0xa   :  { %1850 = vmatprep.subr.bf16.mxu1 %v2035_v10  ;;  %v2050_v25 = vld [vmem:[%s2692_s1 + $0x30] sm:$0xff]   ;;  %v2054_v30 = vld [vmem:[%s2692_s1 + $0x38] sm:$0xff]   ;;  %v2057_v37 = vld [vmem:[%s2692_s1 + $0x140] sm:$0xff]   ;;  %v26_v39 = vcombine.high %v16_v33, %v16_v33  ;;  %v33_v42 = vrot.slane %v16_v33, %v2324_v41 }
   0xb   :  { %1829 = vmatpush3.bf16.msra.mxu0 %v2034_v9  ;;  %v2051_v26 = vld [vmem:[%s2692_s1 + $0xf0] sm:$0xff]   ;;  %v2055_v31 = vld [vmem:[%s2692_s1 + $0xf8] sm:$0xff]   ;;  %v2060_v40 = vld [vmem:[%s2692_s1 + $0x1c0] sm:$0xff]  }
   0xc   :  { %1830 = vmatprep.subr.bf16.mxu0 %v2037_v12  ;;  %v2052_v28 = vld [vmem:[%s2692_s1 + $0xb0] sm:$0xff]   ;;  %v2056_v34 = vld [vmem:[%s2692_s1 + $0xb8] sm:$0xff]   ;;  %v40_v43 = vrot.slane %v26_v39, %v2324_v41  ;;  %v41_v44 = vcombine.high %v33_v42, %v33_v42  ;;  %v2059_v46 = vld [vmem:[%s2692_s1 + $0x100] sm:$0xff]   ;;  %v120_v47 = vpack.c.bf16 %v33_v42, %v33_v42 }
   0xd   :  { %1851 = vmatpush3.bf16.msra.mxu1 %v2036_v11  ;;  %v2061_v49 = vld [vmem:[%s2692_s1 + $0x180] sm:$0xff]   ;;  %v2062_v52 = vld [vmem:[%s2692_s1 + $0x148] sm:$0xff]   ;;  %v2066_v56 = vld [vmem:[%s2692_s1 + $0x150] sm:$0xff]  }
   0xe   :  { %1852 = vmatprep.subr.bf16.mxu1 %v2039_v14  ;;  %v42_v45 = vcombine.high %v40_v43, %v40_v43  ;;  %v122_v48 = vpack.c.bf16 %v40_v43, %v40_v43  ;;  %v121_v50 = vpack.c.bf16 %v41_v44, %v41_v44  ;;  %v2064_v53 = vld [vmem:[%s2692_s1 + $0x1c8] sm:$0xff]   ;;  %v2068_v57 = vld [vmem:[%s2692_s1 + $0x1d0] sm:$0xff]   ;;  %v2070_v60 = vld [vmem:[%s2692_s1 + $0x158] sm:$0xff]  }
   0xf   :  { %1831 = vmatpush3.bf16.msra.mxu0 %v2038_v13  ;;  %v2063_v54 = vld [vmem:[%s2692_s1 + $0x108] sm:$0xff]   ;;  %v2067_v58 = vld [vmem:[%s2692_s1 + $0x110] sm:$0xff]   ;;  %v2072_v61 = vld [vmem:[%s2692_s1 + $0x1d8] sm:$0xff]  }
  0x10   :  { %1832 = vmatprep.subr.bf16.mxu0 %v2041_v16  ;;  %v123_v51 = vpack.c.bf16 %v42_v45, %v42_v45  ;;  %1333 = vmatprep.mubr.bf16.mxu0 %v121_v50  ;;  %v2065_v55 = vld [vmem:[%s2692_s1 + $0x188] sm:$0xff]   ;;  %v2069_v59 = vld [vmem:[%s2692_s1 + $0x190] sm:$0xff]   ;;  %v2071_v62 = vld [vmem:[%s2692_s1 + $0x118] sm:$0xff]  }
  0x11   :  { %1853 = vmatpush3.bf16.msra.mxu1 %v2040_v15  ;;  %v2073_v63 = vld [vmem:[%s2692_s1 + $0x198] sm:$0xff]   ;;  %v2074_v0 = vld [vmem:[%s2692_s1 + $0x160] sm:$0xff]   ;;  %v2078_v4 = vld [vmem:[%s2692_s1 + $0x168] sm:$0xff]  }
  0x12   :  { %1854 = vmatprep.subr.bf16.mxu1 %v2043_v18  ;;  %1373 = vmatprep.mubr.bf16.mxu1 %v123_v51  ;;  %v2076_v1 = vld [vmem:[%s2692_s1 + $0x1e0] sm:$0xff]   ;;  %v2080_v5 = vld [vmem:[%s2692_s1 + $0x1e8] sm:$0xff]   ;;  %v2082_v8 = vld [vmem:[%s2692_s1 + $0x170] sm:$0xff]  }
  0x13   :  { %1833 = vmatpush3.bf16.msra.mxu0 %v2042_v17  ;;  %v2075_v2 = vld [vmem:[%s2692_s1 + $0x120] sm:$0xff]   ;;  %v2079_v6 = vld [vmem:[%s2692_s1 + $0x128] sm:$0xff]   ;;  %v2084_v9 = vld [vmem:[%s2692_s1 + $0x1f0] sm:$0xff]  }
  0x14   :  { %1834 = vmatprep.subr.bf16.mxu0 %v2045_v20  ;;  %v2077_v3 = vld [vmem:[%s2692_s1 + $0x1a0] sm:$0xff]   ;;  %v2081_v7 = vld [vmem:[%s2692_s1 + $0x1a8] sm:$0xff]   ;;  %v2083_v11 = vld [vmem:[%s2692_s1 + $0x130] sm:$0xff]  }
  0x15   :  { %1855 = vmatpush3.bf16.msra.mxu1 %v2044_v19  ;;  %v17_v10 = vld [vmem:[%s2691_s0 + $0x8] sm:$0xff]  ;;  %v2085_v14 = vld [vmem:[%s2692_s1 + $0x1b0] sm:$0xff]   ;;  %v2086_v15 = vld [vmem:[%s2692_s1 + $0x178] sm:$0xff]  }
  0x16   :  { %1856 = vmatprep.subr.bf16.mxu1 %v2047_v22  ;;  %v50_v12 = vrot.slane %v17_v10, %v2324_v41  ;;  %v43_v13 = vcombine.high %v17_v10, %v17_v10  ;;  %v2088_v18 = vld [vmem:[%s2692_s1 + $0x1f8] sm:$0xff]   ;;  %v2096_v32 = vld [vmem:[%s2692_s1 + $0x208] sm:$0xff]   ;;  %v2101_v35 = vld [vmem:[%s2692_s1 + $0x2d0] sm:$0xff]  }
  0x17   :  { %1835 = vmatpush3.bf16.msra.mxu0 %v2046_v21  ;;  %v2087_v19 = vld [vmem:[%s2692_s1 + $0x138] sm:$0xff]   ;;  %v2098_v33 = vld [vmem:[%s2692_s1 + $0x288] sm:$0xff]   ;;  %v2100_v36 = vld [vmem:[%s2692_s1 + $0x210] sm:$0xff]  }
  0x18   :  { %1836 = vmatprep.subr.bf16.mxu0 %v2049_v24  ;;  %v58_v16 = vcombine.high %v50_v12, %v50_v12  ;;  %v57_v17 = vrot.slane %v43_v13, %v2324_v41  ;;  %v2089_v22 = vld [vmem:[%s2692_s1 + $0x1b8] sm:$0xff]   ;;  %v124_v27 = vpack.c.bf16 %v50_v12, %v50_v12  ;;  %v2107_v43 = vld [vmem:[%s2692_s1 + $0x260] sm:$0xff]   ;;  %v2114_v50 = vld [vmem:[%s2692_s1 + $0x2a8] sm:$0xff]  }
  0x19   :  { %1857 = vmatpush3.bf16.msra.mxu1 %v2048_v23  ;;  %v2090_v23 = vld [vmem:[%s2692_s1 + $0x240] sm:$0xff]   ;;  %v2103_v38 = vld [vmem:[%s2692_s1 + $0x258] sm:$0xff]   ;;  %v2115_v51 = vld [vmem:[%s2692_s1 + $0x270] sm:$0xff]  }
  0x1a   :  { %1858 = vmatprep.subr.bf16.mxu1 %v2051_v26  ;;  %v125_v20 = vpack.c.bf16 %v58_v16, %v58_v16  ;;  %v59_v21 = vcombine.high %v57_v17, %v57_v17  ;;  %v2092_v26 = vld [vmem:[%s2692_s1 + $0x200] sm:$0xff]   ;;  %v2105_v39 = vld [vmem:[%s2692_s1 + $0x2d8] sm:$0xff]   ;;  %v2130_v10 = vld [vmem:[%s2692_s1 + $0x3c8] sm:$0xff]  }
  0x1b   :  { %1837 = vmatpush3.bf16.msra.mxu0 %v2050_v25  ;;  %v2093_v25 = vld [vmem:[%s2692_s1 + $0x2c0] sm:$0xff]   ;;  %v2106_v42 = vld [vmem:[%s2692_s1 + $0x298] sm:$0xff]   ;;  %v2131_v12 = vld [vmem:[%s2692_s1 + $0x388] sm:$0xff]  }
  0x1c   :  { %1838 = vmatprep.subr.bf16.mxu0 %v2053_v29  ;;  %v127_v24 = vpack.c.bf16 %v59_v21, %v59_v21  ;;  %v2094_v29 = vld [vmem:[%s2692_s1 + $0x280] sm:$0xff]   ;;  %v2132_v13 = vld [vmem:[%s2692_s1 + $0x350] sm:$0xff]  }
  0x1d   :  { %1859 = vmatpush3.bf16.msra.mxu1 %v2052_v28  ;;  %v126_v28 = vpack.c.bf16 %v57_v17, %v57_v17  ;;  %v2109_v44 = vld [vmem:[%s2692_s1 + $0x2e0] sm:$0xff]   ;;  %v2135_v16 = vld [vmem:[%s2692_s1 + $0x390] sm:$0xff]   ;;  %v2136_v17 = vld [vmem:[%s2692_s1 + $0x358] sm:$0xff]  }
  0x1e   :  { %1860 = vmatprep.subr.bf16.mxu1 %v2055_v31  ;;  %v2097_v31 = vld [vmem:[%s2692_s1 + $0x2c8] sm:$0xff]   ;;  %v2108_v45 = vld [vmem:[%s2692_s1 + $0x220] sm:$0xff]  }
  0x1f   :  { %1839 = vmatpush3.bf16.msra.mxu0 %v2054_v30  ;;  %v2095_v30 = vld [vmem:[%s2692_s1 + $0x248] sm:$0xff]   ;;  %v2140_v21 = vld [vmem:[%s2692_s1 + $0x360] sm:$0xff]  }
  0x20   :  { %1868 = vmatprep.subr.bf16.mxu0 %v2057_v37  ;;  %v2102_v37 = vld [vmem:[%s2692_s1 + $0x290] sm:$0xff]  }
  0x21   :  { %1861 = vmatpush3.bf16.msra.mxu1 %v2056_v34  ;;  %v2099_v34 = vld [vmem:[%s2692_s1 + $0x250] sm:$0xff]  }
  0x22   :  { %1890 = vmatprep.subr.bf16.mxu1 %v2060_v40  ;;  %1334 = vmatmul.mubr.bf16.vlgmr.msra.gmra.mrb[0].mxu0 %v120_v47  ;;  %v2104_v40 = vld [vmem:[%s2692_s1 + $0x218] sm:$0xff]   ;;  %v2111_v47 = vld [vmem:[%s2692_s1 + $0x268] sm:$0xff]  }
  0x23   :  { %1869 = vmatpush3.bf16.msra.mxu0 %v2059_v46  ;;  %1413 = vmatprep.mubr.bf16.mxu0 %v125_v20  ;;  %v2110_v46 = vld [vmem:[%s2692_s1 + $0x2a0] sm:$0xff]   ;;  %v2139_v20 = vld [vmem:[%s2692_s1 + $0x398] sm:$0xff]  }
  0x24   :  { %1374 = vmatmul.mubr.bf16.vlgmr.msra.gmra.mrb[0].mxu1 %v122_v48  ;;  %1870 = vmatprep.subr.bf16.mxu0 %v2062_v52  ;;  %v2113_v48 = vld [vmem:[%s2692_s1 + $0x2e8] sm:$0xff]   ;;  %v2117_v52 = vld [vmem:[%s2692_s1 + $0x2f0] sm:$0xff]  }
  0x25   :  { %1891 = vmatpush3.bf16.msra.mxu1 %v2061_v49  ;;  %1453 = vmatprep.mubr.bf16.mxu1 %v127_v24  ;;  %v2112_v49 = vld [vmem:[%s2692_s1 + $0x228] sm:$0xff]   ;;  %v2143_v24 = vld [vmem:[%s2692_s1 + $0x3a0] sm:$0xff]  }
  0x26   :  { %1892 = vmatprep.subr.bf16.mxu1 %v2064_v53  ;;  %v18_v53 = vld [vmem:[%s2691_s0 + $0x10] sm:$0xff] }
  0x27   :  { %1871 = vmatpush3.bf16.msra.mxu0 %v2063_v54  ;;  %v2116_v54 = vld [vmem:[%s2692_s1 + $0x230] sm:$0xff]  }
  0x28   :  { %1872 = vmatprep.subr.bf16.mxu0 %v2066_v56  ;;  %v60_v56 = vcombine.high %v18_v53, %v18_v53 }
  0x29   :  { %1893 = vmatpush3.bf16.msra.mxu1 %v2065_v55  ;;  %v67_v55 = vrot.slane %v18_v53, %v2324_v41  ;;  %v2162_v53 = vld [vmem:[%s2692_s1 + $0x410] sm:$0xff]  }
  0x2a   :  { %1894 = vmatprep.subr.bf16.mxu1 %v2068_v57  ;;  %v2118_v57 = vld [vmem:[%s2692_s1 + $0x2b0] sm:$0xff]  }
  0x2b   :  { %1873 = vmatpush3.bf16.msra.mxu0 %v2067_v58  ;;  %v2119_v58 = vld [vmem:[%s2692_s1 + $0x278] sm:$0xff]  }
  0x2c   :  { %1874 = vmatprep.subr.bf16.mxu0 %v2070_v60  ;;  %v74_v60 = vrot.slane %v60_v56, %v2324_v41 }
  0x2d   :  { %1895 = vmatpush3.bf16.msra.mxu1 %v2069_v59  ;;  %v75_v59 = vcombine.high %v67_v55, %v67_v55 }
  0x2e   :  { %1896 = vmatprep.subr.bf16.mxu1 %v2072_v61  ;;  %v2121_v61 = vld [vmem:[%s2692_s1 + $0x2f8] sm:$0xff]  }
  0x2f   :  { %1875 = vmatpush3.bf16.msra.mxu0 %v2071_v62  ;;  %v2120_v62 = vld [vmem:[%s2692_s1 + $0x238] sm:$0xff]  }
  0x30   :  { %1876 = vmatprep.subr.bf16.mxu0 %v2074_v0  ;;  %v76_v0 = vcombine.high %v74_v60, %v74_v60 }
  0x31   :  { %1897 = vmatpush3.bf16.msra.mxu1 %v2073_v63  ;;  %v129_v63 = vpack.c.bf16 %v75_v59, %v75_v59 }
  0x32   :  { %1898 = vmatprep.subr.bf16.mxu1 %v2076_v1  ;;  %v2122_v1 = vld [vmem:[%s2692_s1 + $0x2b8] sm:$0xff]  }
  0x33   :  { %1877 = vmatpush3.bf16.msra.mxu0 %v2075_v2  ;;  %v2123_v2 = vld [vmem:[%s2692_s1 + $0x340] sm:$0xff]  }
  0x34   :  { %1878 = vmatprep.subr.bf16.mxu0 %v2078_v4  ;;  %v2126_v4 = vld [vmem:[%s2692_s1 + $0x3c0] sm:$0xff]  }
  0x35   :  { %1899 = vmatpush3.bf16.msra.mxu1 %v2077_v3  ;;  %v131_v3 = vpack.c.bf16 %v76_v0, %v76_v0 }
  0x36   :  { %1900 = vmatprep.subr.bf16.mxu1 %v2080_v5  ;;  %v2125_v5 = vld [vmem:[%s2692_s1 + $0x300] sm:$0xff]  }
  0x37   :  { %1879 = vmatpush3.bf16.msra.mxu0 %v2079_v6  ;;  %v128_v6 = vpack.c.bf16 %v67_v55, %v67_v55 }
  0x38   :  { %1880 = vmatprep.subr.bf16.mxu0 %v2082_v8  ;;  %v2127_v8 = vld [vmem:[%s2692_s1 + $0x380] sm:$0xff]  }
  0x39   :  { %1901 = vmatpush3.bf16.msra.mxu1 %v2081_v7  ;;  %v130_v7 = vpack.c.bf16 %v74_v60, %v74_v60 }
  0x3a   :  { %1902 = vmatprep.subr.bf16.mxu1 %v2084_v9  ;;  %v2128_v9 = vld [vmem:[%s2692_s1 + $0x348] sm:$0xff]  }
  0x3b   :  { %1881 = vmatpush3.bf16.msra.mxu0 %v2083_v11  ;;  %v2129_v11 = vld [vmem:[%s2692_s1 + $0x308] sm:$0xff]  }
  0x3c   :  { %1882 = vmatprep.subr.bf16.mxu0 %v2086_v15  ;;  %v2133_v15 = vld [vmem:[%s2692_s1 + $0x310] sm:$0xff]  }
  0x3d   :  { %1903 = vmatpush3.bf16.msra.mxu1 %v2085_v14  ;;  %v2134_v14 = vld [vmem:[%s2692_s1 + $0x3d0] sm:$0xff]  }
  0x3e   :  { %1904 = vmatprep.subr.bf16.mxu1 %v2088_v18  ;;  %v2138_v18 = vld [vmem:[%s2692_s1 + $0x3d8] sm:$0xff]  }
  0x3f   :  { %1883 = vmatpush3.bf16.msra.mxu0 %v2087_v19  ;;  %v2137_v19 = vld [vmem:[%s2692_s1 + $0x318] sm:$0xff]  }
  0x40   :  { %1912 = vmatprep.subr.bf16.mxu0 %v2090_v23  ;;  %v2141_v23 = vld [vmem:[%s2692_s1 + $0x320] sm:$0xff]  }
  0x41   :  { %1905 = vmatpush3.bf16.msra.mxu1 %v2089_v22  ;;  %v2142_v22 = vld [vmem:[%s2692_s1 + $0x3e0] sm:$0xff]  }
  0x42   :  { %1934 = vmatprep.subr.bf16.mxu1 %v2093_v25  ;;  %1414 = vmatmul.mubr.bf16.vlgmr.msra.gmra.mrb[4].mxu0 %v124_v27  ;;  %v2144_v25 = vld [vmem:[%s2692_s1 + $0x368] sm:$0xff]  }
  0x43   :  { %1913 = vmatpush3.bf16.msra.mxu0 %v2092_v26  ;;  %1493 = vmatprep.mubr.bf16.mxu0 %v129_v63  ;;  %v2146_v26 = vld [vmem:[%s2692_s1 + $0x3e8] sm:$0xff]  }
  0x44   :  { %1454 = vmatmul.mubr.bf16.vlgmr.msra.gmra.mrb[4].mxu1 %v126_v28  ;;  %1914 = vmatprep.subr.bf16.mxu0 %v2095_v30  ;;  %v2145_v27 = vld [vmem:[%s2692_s1 + $0x328] sm:$0xff]   ;;  %v2150_v30 = vld [vmem:[%s2692_s1 + $0x3f0] sm:$0xff]  }
  0x45   :  { %1935 = vmatpush3.bf16.msra.mxu1 %v2094_v29  ;;  %1533 = vmatprep.mubr.bf16.mxu1 %v131_v3  ;;  %v2147_v28 = vld [vmem:[%s2692_s1 + $0x3a8] sm:$0xff]   ;;  %v2148_v29 = vld [vmem:[%s2692_s1 + $0x370] sm:$0xff]  }
  0x46   :  { %1936 = vmatprep.subr.bf16.mxu1 %v2097_v31  ;;  %v2149_v31 = vld [vmem:[%s2692_s1 + $0x330] sm:$0xff]  }
  0x47   :  { %1915 = vmatpush3.bf16.msra.mxu0 %v2096_v32  ;;  %v19_v32 = vld [vmem:[%s2691_s0 + $0x18] sm:$0xff] }
  0x48   :  { %1916 = vmatprep.subr.bf16.mxu0 %v2099_v34  ;;  %v84_v34 = vrot.slane %v19_v32, %v2324_v41 }
  0x49   :  { %1937 = vmatpush3.bf16.msra.mxu1 %v2098_v33  ;;  %v2151_v33 = vld [vmem:[%s2692_s1 + $0x3b0] sm:$0xff]  }
  0x4a   :  { %1938 = vmatprep.subr.bf16.mxu1 %v2101_v35  ;;  %v77_v35 = vcombine.high %v19_v32, %v19_v32 }
  0x4b   :  { %1917 = vmatpush3.bf16.msra.mxu0 %v2100_v36  ;;  %v2152_v36 = vld [vmem:[%s2692_s1 + $0x378] sm:$0xff]  }
  0x4c   :  { %1918 = vmatprep.subr.bf16.mxu0 %v2103_v38  ;;  %v92_v38 = vcombine.high %v84_v34, %v84_v34 }
  0x4d   :  { %1939 = vmatpush3.bf16.msra.mxu1 %v2102_v37  ;;  %v2154_v37 = vld [vmem:[%s2692_s1 + $0x3f8] sm:$0xff]  }
  0x4e   :  { %1940 = vmatprep.subr.bf16.mxu1 %v2105_v39  ;;  %v91_v39 = vrot.slane %v77_v35, %v2324_v41  ;;  %v132_v41 = vpack.c.bf16 %v84_v34, %v84_v34 }
  0x4f   :  { %1919 = vmatpush3.bf16.msra.mxu0 %v2104_v40  ;;  %v2153_v40 = vld [vmem:[%s2692_s1 + $0x338] sm:$0xff]  }
  0x50   :  { %1920 = vmatprep.subr.bf16.mxu0 %v2107_v43  ;;  %v93_v43 = vcombine.high %v91_v39, %v91_v39 }
  0x51   :  { %1941 = vmatpush3.bf16.msra.mxu1 %v2106_v42  ;;  %v133_v42 = vpack.c.bf16 %v92_v38, %v92_v38 }
  0x52   :  { %1942 = vmatprep.subr.bf16.mxu1 %v2109_v44  ;;  %v2155_v44 = vld [vmem:[%s2692_s1 + $0x3b8] sm:$0xff]  }
  0x53   :  { %1921 = vmatpush3.bf16.msra.mxu0 %v2108_v45  ;;  %v2156_v45 = vld [vmem:[%s2692_s1 + $0x440] sm:$0xff]  }
  0x54   :  { %1922 = vmatprep.subr.bf16.mxu0 %v2111_v47  ;;  %v134_v47 = vpack.c.bf16 %v91_v39, %v91_v39 }
  0x55   :  { %1943 = vmatpush3.bf16.msra.mxu1 %v2110_v46  ;;  %v135_v46 = vpack.c.bf16 %v93_v43, %v93_v43 }
  0x56   :  { %1944 = vmatprep.subr.bf16.mxu1 %v2113_v48  ;;  %v2158_v48 = vld [vmem:[%s2692_s1 + $0x400] sm:$0xff]  }
  0x57   :  { %1923 = vmatpush3.bf16.msra.mxu0 %v2112_v49  ;;  %v2159_v49 = vld [vmem:[%s2692_s1 + $0x448] sm:$0xff]  }
  0x58   :  { %1924 = vmatprep.subr.bf16.mxu0 %v2115_v51  ;;  %v2161_v51 = vld [vmem:[%s2692_s1 + $0x450] sm:$0xff]  }
  0x59   :  { %1945 = vmatpush3.bf16.msra.mxu1 %v2114_v50  ;;  %v2160_v50 = vld [vmem:[%s2692_s1 + $0x408] sm:$0xff]  }
  0x5a   :  { %1946 = vmatprep.subr.bf16.mxu1 %v2117_v52  ;;  %v1677_v52 = vld.sshfl [vmem:[%s2691_s0 + $0x20] sm:$0x33 pattern:$0x76325410] }
  0x5b   :  { %1925 = vmatpush3.bf16.msra.mxu0 %v2116_v54  ;;  %v101_v54 = vcombine.high %v1677_v52, %v1677_v52 }
  0x5c   :  { %1926 = vmatprep.subr.bf16.mxu0 %v2119_v58 }
  0x5d   :  { %1947 = vmatpush3.bf16.msra.mxu1 %v2118_v57 }
  0x5e   :  { %1948 = vmatprep.subr.bf16.mxu1 %v2121_v61 }
  0x5f   :  { %1927 = vmatpush3.bf16.msra.mxu0 %v2120_v62 }
  0x60   :  { %1956 = vmatprep.subr.bf16.mxu0 %v2123_v2 }
  0x61   :  { %1949 = vmatpush3.bf16.msra.mxu1 %v2122_v1 }
  0x62   :  { %1978 = vmatprep.subr.bf16.mxu1 %v2126_v4  ;;  %1494 = vmatmul.mubr.bf16.vlgmr.msra.gmra.mrb[8].mxu0 %v128_v6 }
  0x63   :  { %1957 = vmatpush3.bf16.msra.mxu0 %v2125_v5  ;;  %1573 = vmatprep.mubr.bf16.mxu0 %v133_v42 }
  0x64   :  { %1534 = vmatmul.mubr.bf16.vlgmr.msra.gmra.mrb[8].mxu1 %v130_v7  ;;  %1958 = vmatprep.subr.bf16.mxu0 %v2128_v9 }
  0x65   :  { %1979 = vmatpush3.bf16.msra.mxu1 %v2127_v8  ;;  %1613 = vmatprep.mubr.bf16.mxu1 %v135_v46 }
  0x66   :  { %1980 = vmatprep.subr.bf16.mxu1 %v2130_v10 }
  0x67   :  { %1959 = vmatpush3.bf16.msra.mxu0 %v2129_v11 }
  0x68   :  { %1960 = vmatprep.subr.bf16.mxu0 %v2132_v13 }
  0x69   :  { %1981 = vmatpush3.bf16.msra.mxu1 %v2131_v12 }
  0x6a   :  { %1982 = vmatprep.subr.bf16.mxu1 %v2134_v14 }
  0x6b   :  { %1961 = vmatpush3.bf16.msra.mxu0 %v2133_v15 }
  0x6c   :  { %1962 = vmatprep.subr.bf16.mxu0 %v2136_v17 }
  0x6d   :  { %1983 = vmatpush3.bf16.msra.mxu1 %v2135_v16 }
  0x6e   :  { %1984 = vmatprep.subr.bf16.mxu1 %v2138_v18 }
  0x6f   :  { %1963 = vmatpush3.bf16.msra.mxu0 %v2137_v19 }
  0x70   :  { %1964 = vmatprep.subr.bf16.mxu0 %v2140_v21 }
  0x71   :  { %1985 = vmatpush3.bf16.msra.mxu1 %v2139_v20 }
  0x72   :  { %1986 = vmatprep.subr.bf16.mxu1 %v2142_v22 }
  0x73   :  { %1965 = vmatpush3.bf16.msra.mxu0 %v2141_v23 }
  0x74   :  { %1966 = vmatprep.subr.bf16.mxu0 %v2144_v25 }
  0x75   :  { %1987 = vmatpush3.bf16.msra.mxu1 %v2143_v24 }
  0x76   :  { %1988 = vmatprep.subr.bf16.mxu1 %v2146_v26 }
  0x77   :  { %1967 = vmatpush3.bf16.msra.mxu0 %v2145_v27 }
  0x78   :  { %1968 = vmatprep.subr.bf16.mxu0 %v2148_v29 }
  0x79   :  { %1989 = vmatpush3.bf16.msra.mxu1 %v2147_v28 }
  0x7a   :  { %1990 = vmatprep.subr.bf16.mxu1 %v2150_v30 }
  0x7b   :  { %1969 = vmatpush3.bf16.msra.mxu0 %v2149_v31 }
  0x7c   :  { %1970 = vmatprep.subr.bf16.mxu0 %v2152_v36 }
  0x7d   :  { %1991 = vmatpush3.bf16.msra.mxu1 %v2151_v33 }
  0x7e   :  { %1992 = vmatprep.subr.bf16.mxu1 %v2154_v37 }
  0x7f   :  { %1971 = vmatpush3.bf16.msra.mxu0 %v2153_v40 }
  0x80   :  { %2000 = vmatprep.subr.bf16.mxu0 %v2156_v45 }
  0x81   :  { %1993 = vmatpush3.bf16.msra.mxu1 %v2155_v44 }
  0x82   :  { %1574 = vmatmul.mubr.bf16.vlgmr.msra.gmra.mrb[12].mxu0 %v132_v41 }
  0x83   :  { %2001 = vmatpush3.bf16.msra.mxu0 %v2158_v48 }
  0x84   :  { %1614 = vmatmul.mubr.bf16.vlgmr.msra.gmra.mrb[12].mxu1 %v134_v47  ;;  %2002 = vmatprep.subr.bf16.mxu0 %v2159_v49 }
  0x87   :  { %2003 = vmatpush3.bf16.msra.mxu0 %v2160_v50 }
  0x88   :  { %8 = vsyncpa [#allocation3], 0  ;;  %2004 = vmatprep.subr.bf16.mxu0 %v2161_v51  ;;  %v2163_v55 = vld [vmem:[%s2692_s1 + $0x458] sm:$0xff]   ;;  %vm1293_vm0 = vcmask 982016   ;;  %v137_v56 = vpack.c.bf16 %v101_v54, %v101_v54  ;;  %v2165_v58 = vld [vmem:[%s2692_s1 + $0x460] sm:$0xff]   ;;  %vm1297_vm1 = vcmask 1043456   ;;  %v136_v2 = vpack.c.bf16 %v1677_v52, %v1677_v52 }
  0x89   :  { %v2164_v57 = vld [vmem:[%s2692_s1 + $0x418] sm:$0xff]   ;;  %v2166_v59 = vld [vmem:[%s2692_s1 + $0x420] sm:$0xff]   ;;  %v2167_v60 = vld [vmem:[%s2692_s1 + $0x468] sm:$0xff]   ;;  %vm1661_vm2 = vcmask 58368  }
  0x8a   :  { %1823 = vmatprep.mubr.msk.bf16.mxu0 %vm1293_vm0, %v137_v56  ;;  %v2168_v61 = vld [vmem:[%s2692_s1 + $0x428] sm:$0xff]   ;;  %v2169_v62 = vld [vmem:[%s2692_s1 + $0x470] sm:$0xff]   ;;  %v2171_v0 = vld [vmem:[%s2692_s1 + $0x478] ss:$0 sps:$4 sm:$0xff]  }
  0x8b   :  { %2005 = vmatpush3.bf16.msra.mxu0 %v2162_v53  ;;  %v2170_v63 = vld [vmem:[%s2692_s1 + $0x430] sm:$0xff]   ;;  %v2172_v1 = vld [vmem:[%s2692_s1 + $0x438] sm:$0xff]   ;;  %v1678_v5 = vld [vmem:[%s2693_s2] ss:$0 sm:$0xff]  ;;  %s2198_s1 = smov [#allocation2]  }
  0x8c   :  { %2006 = vmatprep.subr.bf16.mxu0 %v2163_v55  ;;  %s1669_s2 = sshll.u32 %s2198_s1, 4  ;;  %s1670_s2 = int_to_ptr.vmem [resolvable:$true] %s1669_s2 }
  0x8d   :  { %s2173_s14 = scalar_lea.vmem %s1670_s2, 32  ;;  %p2178_p1 = scmp.lt.s32.totalorder %s1670_s2, %s1670_s2 }
  0x8e   :  { %p2174_p0 = scmp.ne.s32.totalorder %s1670_s2, %s2173_s14  ;;  %p2179_p2 = scmp.lt.s32.totalorder %s2173_s14, %s2173_s14 }
  0x8f   :  { %2007 = vmatpush3.bf16.msra.mxu0 %v2164_v57 }
  0x90   :  { %2008 = vmatprep.subr.bf16.mxu0 %v2165_v58  ;;  %p2180_p3 = por %p2179_p2, %p2178_p1 }
  0x92   :  { %p2181_p4 = pnand %p2180_p3, %p2174_p0 }
  0x93   :  { %2009 = vmatpush3.bf16.msra.mxu0 %v2166_v59 }
  0x94   :  { %2010 = vmatprep.subr.bf16.mxu0 %v2167_v60 }
  0x97   :  { %2011 = vmatpush3.bf16.msra.mxu0 %v2168_v61 }
  0x98   :  { %2012 = vmatprep.subr.bf16.mxu0 %v2169_v62 }
  0x9b   :  { %2013 = vmatpush3.bf16.msra.mxu0 %v2170_v63 }
  0x9c   :  { %2022 = vmatprep.subr.msk.bf16.mxu0 %vm1297_vm1, %v2171_v0 }
  0x9f   :  { %2015 = vmatpush3.bf16.msra.mxu0 %v2172_v1 }
  0xa2   :  { %1654 = vmatmul.mubr.bf16.vlgmr.msra.gmra.mrb[16].mxu0 %v136_v2 }
  0xf5   :  { %v1840_v3 = vpop.f32.mrb[0].mxu0 }
  0xf6   :  { %v1841_v6 = vpop.f32.mrb[1].mxu0 }
  0xf7   :  { %v1862_v4 = vpop.f32.mrb[0].mxu1  ;;  %v1842_v8 = vadd.f32 %v1841_v6, %v1840_v3  ;;  %v1843_v9 = vpop.f32.mrb[2].mxu0 }
  0xf8   :  { %v1863_v7 = vpop.f32.mrb[1].mxu1  ;;  %v1844_v12 = vpop.f32.mrb[3].mxu0 }
  0xf9   :  { %v1864_v10 = vadd.f32 %v1863_v7, %v1862_v4  ;;  %v1865_v11 = vpop.f32.mrb[2].mxu1  ;;  %v1336_v14 = vadd.f32 %v1842_v8, %v1678_v5 }
  0xfa   :  { %v1866_v13 = vpop.f32.mrb[3].mxu1 }
  0xfb   :  { %v1376_v15 = vadd.f32 %v1864_v10, %v1336_v14 }
 0x115   :  { %v1884_v16 = vpop.f32.mrb[4].mxu0 }
 0x116   :  { %v1885_v18 = vpop.f32.mrb[5].mxu0 }
 0x117   :  { %v1906_v17 = vpop.f32.mrb[4].mxu1  ;;  %v1886_v20 = vadd.f32 %v1885_v18, %v1884_v16  ;;  %v1887_v21 = vpop.f32.mrb[6].mxu0 }
 0x118   :  { %v1907_v19 = vpop.f32.mrb[5].mxu1  ;;  %v1888_v24 = vpop.f32.mrb[7].mxu0 }
 0x119   :  { %v1908_v22 = vadd.f32 %v1907_v19, %v1906_v17  ;;  %v1909_v23 = vpop.f32.mrb[6].mxu1  ;;  %v1416_v26 = vadd.f32 %v1886_v20, %v1376_v15 }
 0x11a   :  { %v1910_v25 = vpop.f32.mrb[7].mxu1 }
 0x11b   :  { %v1456_v27 = vadd.f32 %v1908_v22, %v1416_v26 }
 0x135   :  { %v1928_v28 = vpop.f32.mrb[8].mxu0 }
 0x136   :  { %v1929_v30 = vpop.f32.mrb[9].mxu0 }
 0x137   :  { %v1950_v29 = vpop.f32.mrb[8].mxu1  ;;  %v1930_v32 = vadd.f32 %v1929_v30, %v1928_v28  ;;  %v1931_v33 = vpop.f32.mrb[10].mxu0 }
 0x138   :  { %v1951_v31 = vpop.f32.mrb[9].mxu1  ;;  %v1932_v36 = vpop.f32.mrb[11].mxu0 }
 0x139   :  { %v1952_v34 = vadd.f32 %v1951_v31, %v1950_v29  ;;  %v1953_v35 = vpop.f32.mrb[10].mxu1  ;;  %v1496_v38 = vadd.f32 %v1930_v32, %v1456_v27 }
 0x13a   :  { %v1954_v37 = vpop.f32.mrb[11].mxu1 }
 0x13b   :  { %v1536_v39 = vadd.f32 %v1952_v34, %v1496_v38 }
 0x155   :  { %v1972_v40 = vpop.f32.mrb[12].mxu0 }
 0x156   :  { %v1973_v43 = vpop.f32.mrb[13].mxu0 }
 0x157   :  { %v1994_v42 = vpop.f32.mrb[12].mxu1  ;;  %v1974_v45 = vadd.f32 %v1973_v43, %v1972_v40  ;;  %v1975_v46 = vpop.f32.mrb[14].mxu0 }
 0x158   :  { %v1995_v44 = vpop.f32.mrb[13].mxu1  ;;  %v1976_v48 = vpop.f32.mrb[15].mxu0 }
 0x159   :  { %v1996_v41 = vadd.f32 %v1995_v44, %v1994_v42  ;;  %v1997_v47 = vpop.f32.mrb[14].mxu1  ;;  %v1576_v50 = vadd.f32 %v1974_v45, %v1536_v39 }
 0x15a   :  { %v1998_v49 = vpop.f32.mrb[15].mxu1 }
 0x15b   :  { %v1616_v51 = vadd.f32 %v1996_v41, %v1576_v50 }
 0x175   :  { %v2016_v52 = vpop.f32.mrb[16].mxu0 }
 0x176   :  { %v2017_v53 = vpop.f32.mrb[17].mxu0 }
 0x177   :  { %v2018_v54 = vadd.f32 %v2017_v53, %v2016_v52  ;;  %v2019_v55 = vpop.f32.mrb[18].mxu0 }
 0x178   :  { %v2020_v56 = vpop.f32.mrb[19].mxu0 }
 0x179   :  { %v1656_v57 = vadd.f32 %v2018_v54, %v1616_v51 }
 0x17b   :  { %1662 = vst.msk [vmem:[#allocation2] sm:$0x3] %vm1661_vm2, %v1656_v57 }
 0x17c   :  { %2184 = shalt.err (!%p2181_p4)
}
 0x17d   :  { %s2185_s17 = scalar_lea.hbm %s2694_s3, 32 }
 0x17e   :  { %p2186_p5 = scmp.ne.s32.totalorder %s2694_s3, %s2185_s17  ;;  %p2189_p6 = scmp.lt.u32.totalorder %s2185_s17, %s2694_s3 }
 0x180   :  { %p2191_p7 = pnand %p2189_p6, %p2186_p5 }
 0x182   :  { %2194 = shalt.err (!%p2191_p7)
}
 0x183   :  { %1672 = dma.vmem_to_hbm [thread:$0]  %s1670_s2, 32, %s2694_s3, [#allocation3]  }
 0x184   :  { %2195 = dma.done.wait [#allocation3], 32  }
 0x185   :  { %2196 = vsyncadd [#allocation3], 4294967264 }
 0x186   :  { %1676 = vsyncpa [#allocation3], 1 }

</bundles_post_ra>
